<compile_context>
chip_gen: v7x
topology: tpu7x:2x2x1
jax: 0.10.0
libtpu: 0.0.40
codegen_flags: <defaults>
</compile_context>

<pallas_src>
import functools
import math

import jax
import jax.numpy as jnp
from jax.experimental import pallas as pl
from jax.experimental.pallas import tpu as pltpu

EPS = 1e-5


def residual_kernel(lout, h, mxu_dtype,
                    x_ref, b1_ref, b2_ref, mmat_ref, vecs_ref, out_ref):
    f32 = jnp.float32

    x = x_ref[...]                    # (R, Lin_pad) f32, lane-dense (w, c) lanes
    mmat = mmat_ref[...]              # (Lout, Lout) f32, includes 1/(N*H*W)
    vecs = vecs_ref[...]              # (8, Lout) f32: g1,be1,g2,be2,gd,bed,bd,pad

    def shift(v, up):
        # up=True : result[i] = v[i-1] (halo for kernel row dh=-1)
        # up=False: result[i] = v[i+1] (halo for kernel row dh=+1)
        # XLU roll + VPU select; no MXU, no (R,R) operand.
        r = v.shape[0]
        rolled = pltpu.roll(v, 1 if up else r - 1, 0)
        ridx = jax.lax.broadcasted_iota(jnp.int32, v.shape, 0)
        keep = (ridx % h) != (0 if up else h - 1)          # per-image boundary
        return jnp.where(keep, rolled, 0.0)

    def bn(y, gamma, beta):
        # Training-mode BatchNorm over (N,H,W) per channel, lane-dense.
        # Reduce rows first, then a single (1,L)x(L,L) averaging matmul.
        mean = jnp.dot(jnp.sum(y, axis=0, keepdims=True), mmat,
                       preferred_element_type=f32)
        d = y - mean
        var = jnp.dot(jnp.sum(d * d, axis=0, keepdims=True), mmat,
                      preferred_element_type=f32)
        scale = gamma * jax.lax.rsqrt(var + EPS)           # fold gamma pre-broadcast
        return d * scale + beta

    # ---- conv1 (3x3 'same') + fused 1x1 downsample: ONE MXU matmul, K = 3*Lin ----
    xcat = jnp.concatenate([shift(x, True), x, shift(x, False)], axis=1)
    y1 = jnp.dot(xcat.astype(mxu_dtype), b1_ref[...], preferred_element_type=f32)
    acc1 = y1[:, :lout]
    idn = y1[:, lout:] + vecs[6:7]                          # + downsample bias

    h1 = jnp.maximum(bn(acc1, vecs[0:1], vecs[1:2]), 0.0)   # BN1 + ReLU (f32)

    # ---- conv2 (3x3 'same'): ONE MXU matmul, K = 3*Lout -------------------------
    hcat = jnp.concatenate([shift(h1, True), h1, shift(h1, False)], axis=1)
    acc2 = jnp.dot(hcat.astype(mxu_dtype), b2_ref[...], preferred_element_type=f32)

    h2 = bn(acc2, vecs[2:3], vecs[3:4])
    idn = bn(idn, vecs[4:5], vecs[5:6])

    # residual add + final ReLU; single unmasked lane-dense store
    out_ref[...] = jnp.maximum(h2 + idn, 0.0).astype(out_ref.dtype)


def _pack_operands(params, n, h, w, cin_pad, mxu_dtype):
    """Build the lane-dense structured operands (stacked conv matrices, averaging
    matrix, packed BN/bias vectors) consumed by the kernel."""
    f32 = jnp.float32
    cin = params["w1"].shape[2]
    cout = params["w1"].shape[-1]
    lout = w * cout

    w1 = params["w1"].astype(f32)
    wd = params["wd"].astype(f32)
    if cin_pad != cin:                                      # zero-pad input channels
        w1 = jnp.pad(w1, ((0, 0), (0, 0), (0, cin_pad - cin), (0, 0)))
        wd = jnp.pad(wd, ((0, cin_pad - cin), (0, 0)))
    w2 = params["w2"].astype(f32)

    def tap(wk, s):
        # (W*Ci, W*Co) block-banded matrix applying the three horizontal taps of
        # kernel row `s` with 'same' zeroing at the w boundary.
        ci, co = wk.shape[2], wk.shape[3]
        m = jnp.zeros((w * ci, w * co), f32)
        for t in (-1, 0, 1):
            p = jnp.eye(w, w, k=-t, dtype=f32)
            m = m + jnp.kron(p, wk[s + 1, t + 1])
        return m

    # conv1 row-stacked weights, center block carries the fused 1x1 downsample
    dmat = jnp.kron(jnp.eye(w, dtype=f32), wd)              # (W*Cin_pad, Lout)
    zblk = jnp.zeros_like(dmat)
    b1 = jnp.concatenate([
        jnp.concatenate([tap(w1, -1), zblk], axis=1),
        jnp.concatenate([tap(w1, 0), dmat], axis=1),
        jnp.concatenate([tap(w1, +1), zblk], axis=1),
    ], axis=0).astype(mxu_dtype)                            # (3*Lin_pad, 2*Lout)

    # conv2 row-stacked weights
    b2 = jnp.concatenate([tap(w2, -1), tap(w2, 0), tap(w2, +1)],
                         axis=0).astype(mxu_dtype)          # (3*Lout, Lout)

    # per-channel averaging matrix for BN stats (includes 1/(N*H*W)); kept f32 —
    # it only ever multiplies a (1, Lout) row after the reordered reduction.
    mmat = jnp.kron(jnp.ones((w, w), f32), jnp.eye(cout, dtype=f32)) / (n * h * w)

    def lane(v):                                            # (.., C) -> (W*C,)
        return jnp.tile(jnp.reshape(v.astype(f32), (-1,)), w)

    vecs = jnp.stack([lane(params["g1"]), lane(params["be1"]),
                      lane(params["g2"]), lane(params["be2"]),
                      lane(params["gd"]), lane(params["bed"]),
                      lane(params["bd"]), jnp.zeros((lout,), f32)], axis=0)  # (8, Lout)
    return b1, b2, mmat, vecs


@functools.partial(jax.jit, static_argnames=("mxu_dtype",))
def residual_forward(x_nchw, params, *, mxu_dtype=jnp.bfloat16):
    n, cin, h, w = x_nchw.shape
    cout = params["w1"].shape[-1]
    r, lout = n * h, w * cout                               # lout = 128 at test shape

    # zero-pad Cin so W*Cin fills whole 128-lane vregs / MXU K depth (4 -> 8 here)
    lin = w * cin
    lin_pad = ((lin + 127) // 128) * 128
    cin_pad = lin_pad // w if lin_pad % w == 0 else cin
    lin_pad = w * cin_pad

    f32 = jnp.float32
    x = jnp.transpose(x_nchw, (0, 2, 3, 1)).astype(f32)     # NHWC
    if cin_pad != cin:
        x = jnp.pad(x, ((0, 0), (0, 0), (0, 0), (0, cin_pad - cin)))
    # lane-dense layout: rows = (n, h), lanes = (w, c) with channel fastest
    x2d = x.reshape(r, lin_pad)

    b1, b2, mmat, vecs = _pack_operands(params, n, h, w, cin_pad, mxu_dtype)
    operands = (x2d, b1, b2, mmat, vecs)

    # scoped-VMEM limit sized from the actual footprint (well under 2 MiB here)
    op_bytes = sum(math.prod(o.shape) * o.dtype.itemsize for o in operands)
    out_bytes = r * lout * 4
    vmem_limit = int(max(6 * (op_bytes + out_bytes), 2 * 1024 * 1024))

    kernel = functools.partial(residual_kernel, lout, h, mxu_dtype)
    vmem = pl.BlockSpec(memory_space=pltpu.MemorySpace.VMEM)
    out2d = pl.pallas_call(
        kernel,
        out_shape=jax.ShapeDtypeStruct((r, lout), jnp.float32),
        in_specs=[vmem] * len(operands),
        out_specs=vmem,
        compiler_params=pltpu.CompilerParams(vmem_limit_bytes=vmem_limit),
    )(*operands)
    return jnp.transpose(out2d.reshape(n, h, w, cout), (0, 3, 1, 2))  # NCHW


def residual_ref(x_nchw, params):
    # Pure-JAX reference (XLA convs) for correctness checking.
    x = jnp.transpose(x_nchw, (0, 2, 3, 1))
    cin = x.shape[-1]
    cout = params["w1"].shape[-1]

    def conv(a, wgt, pad):
        return jax.lax.conv_general_dilated(
            a, wgt, window_strides=(1, 1), padding=pad,
            dimension_numbers=("NHWC", "HWIO", "NHWC"))

    def bn(a, g, b):
        mean = jnp.mean(a, axis=(0, 1, 2), keepdims=True)
        var = jnp.mean((a - mean) ** 2, axis=(0, 1, 2), keepdims=True)
        return (a - mean) * jax.lax.rsqrt(var + EPS) * g + b

    h1 = jax.nn.relu(bn(conv(x, params["w1"], "SAME"), params["g1"], params["be1"]))
    h2 = bn(conv(h1, params["w2"], "SAME"), params["g2"], params["be2"])
    idn = conv(x, params["wd"].reshape(1, 1, cin, cout), "VALID") + params["bd"]
    idn = bn(idn, params["gd"], params["bed"])
    return jnp.transpose(jax.nn.relu(h2 + idn), (0, 3, 1, 2))


if __name__ == "__main__":
    N, CIN, COUT, H, W = 2, 4, 8, 16, 16
    key = jax.random.PRNGKey(0)
    ks = jax.random.split(key, 5)
    params = dict(
        w1=jax.random.normal(ks[0], (3, 3, CIN, COUT), jnp.float32) * 0.1,
        w2=jax.random.normal(ks[1], (3, 3, COUT, COUT), jnp.float32) * 0.1,
        wd=jax.random.normal(ks[2], (CIN, COUT), jnp.float32) * 0.1,
        bd=jax.random.normal(ks[3], (1, COUT), jnp.float32) * 0.1,
        g1=jnp.ones((1, COUT), jnp.float32), be1=jnp.zeros((1, COUT), jnp.float32),
        g2=jnp.ones((1, COUT), jnp.float32), be2=jnp.zeros((1, COUT), jnp.float32),
        gd=jnp.ones((1, COUT), jnp.float32), bed=jnp.zeros((1, COUT), jnp.float32),
    )
    x = jax.random.normal(ks[4], (N, CIN, H, W), jnp.float32)

    ref = residual_ref(x, params)

    # f32-MXU debug path: strict reference check.
    out_f32 = jax.block_until_ready(residual_forward(x, params, mxu_dtype=jnp.float32))
    assert out_f32.shape == (N, COUT, H, W)
    if not jnp.allclose(out_f32, ref, atol=1e-4, rtol=1e-4):
        raise AssertionError("f32 Pallas kernel does not match JAX reference")

    # bf16-MXU fast path (native MXU rate on v5e/v6e/v7x): bf16-tap tolerance.
    out_bf16 = jax.block_until_ready(residual_forward(x, params, mxu_dtype=jnp.bfloat16))
    assert out_bf16.shape == (N, COUT, H, W)
    if not jnp.allclose(out_bf16, ref, atol=1e-1, rtol=1e-1):
        raise AssertionError("bf16 Pallas kernel does not match JAX reference")

    print("KERNEL_OK")
</pallas_src>

<mosaic_0001>
module attributes {stable_mosaic.version = 11 : i64} {
  func.func @residual_kernel(%arg0: memref<32x128xf32, #tpu.memory_space<vmem>>, %arg1: memref<384x256xf32, #tpu.memory_space<vmem>>, %arg2: memref<384x128xf32, #tpu.memory_space<vmem>>, %arg3: memref<128x128xf32, #tpu.memory_space<vmem>>, %arg4: memref<8x128xf32, #tpu.memory_space<vmem>>, %arg5: memref<32x128xf32, #tpu.memory_space<vmem>>) attributes {dimension_semantics = [], scalar_prefetch = 0 : i64, scratch_operands = 0 : i64, tpu.core_type = #tpu.core_type<tc>} {
    %c0 = arith.constant 0 : index
    %c0_0 = arith.constant 0 : index
    %0 = vector.load %arg0[%c0, %c0_0] : memref<32x128xf32, #tpu.memory_space<vmem>>, vector<32x128xf32>
    %c0_1 = arith.constant 0 : index
    %c0_2 = arith.constant 0 : index
    %1 = vector.load %arg3[%c0_1, %c0_2] : memref<128x128xf32, #tpu.memory_space<vmem>>, vector<128x128xf32>
    %c0_3 = arith.constant 0 : index
    %c0_4 = arith.constant 0 : index
    %2 = vector.load %arg4[%c0_3, %c0_4] : memref<8x128xf32, #tpu.memory_space<vmem>>, vector<8x128xf32>
    %c1_i32 = arith.constant 1 : i32
    %3 = tpu.dynamic_rotate %0 by %c1_i32 dim 0 : vector<32x128xf32>, i32 -> vector<32x128xf32>
    %4 = tpu.iota {dimensions = array<i32: 0>} : vector<32x128xi32>
    %c16_i32 = arith.constant 16 : i32
    %c0_i32 = arith.constant 0 : i32
    %5 = arith.cmpi eq, %c16_i32, %c0_i32 : i32
    %c1_i32_5 = arith.constant 1 : i32
    %6 = arith.select %5, %c1_i32_5, %c16_i32 : i32
    %7 = vector.broadcast %6 : i32 to vector<32x128xi32>
    %8 = arith.remsi %4, %7 : vector<32x128xi32>
    %c0_i32_6 = arith.constant 0 : i32
    %9 = vector.broadcast %c0_i32_6 : i32 to vector<32x128xi32>
    %10 = arith.cmpi ne, %8, %9 : vector<32x128xi32>
    %c0_i32_7 = arith.constant 0 : i32
    %11 = vector.broadcast %c0_i32_7 : i32 to vector<32x128xi32>
    %12 = arith.cmpi slt, %8, %11 : vector<32x128xi32>
    %c0_i32_8 = arith.constant 0 : i32
    %13 = arith.cmpi slt, %6, %c0_i32_8 : i32
    %14 = vector.broadcast %13 : i1 to vector<32x128xi1>
    %15 = vector.broadcast %14 : vector<32x128xi1> to vector<32x128xi1>
    %16 = arith.xori %12, %15 : vector<32x128xi1>
    %17 = arith.andi %16, %10 : vector<32x128xi1>
    %18 = vector.broadcast %6 : i32 to vector<32x128xi32>
    %19 = arith.addi %8, %18 : vector<32x128xi32>
    %20 = arith.select %17, %19, %8 : vector<32x128xi1>, vector<32x128xi32>
    %c0_i32_9 = arith.constant 0 : i32
    %21 = vector.broadcast %c0_i32_9 : i32 to vector<32x128xi32>
    %22 = arith.cmpi ne, %20, %21 : vector<32x128xi32>
    %cst = arith.constant 0.000000e+00 : f32
    %23 = vector.broadcast %cst : f32 to vector<32x128xf32>
    %24 = arith.select %22, %3, %23 : vector<32x128xi1>, vector<32x128xf32>
    %c31_i32 = arith.constant 31 : i32
    %25 = tpu.dynamic_rotate %0 by %c31_i32 dim 0 : vector<32x128xf32>, i32 -> vector<32x128xf32>
    %26 = tpu.iota {dimensions = array<i32: 0>} : vector<32x128xi32>
    %c16_i32_10 = arith.constant 16 : i32
    %c0_i32_11 = arith.constant 0 : i32
    %27 = arith.cmpi eq, %c16_i32_10, %c0_i32_11 : i32
    %c1_i32_12 = arith.constant 1 : i32
    %28 = arith.select %27, %c1_i32_12, %c16_i32_10 : i32
    %29 = vector.broadcast %28 : i32 to vector<32x128xi32>
    %30 = arith.remsi %26, %29 : vector<32x128xi32>
    %c0_i32_13 = arith.constant 0 : i32
    %31 = vector.broadcast %c0_i32_13 : i32 to vector<32x128xi32>
    %32 = arith.cmpi ne, %30, %31 : vector<32x128xi32>
    %c0_i32_14 = arith.constant 0 : i32
    %33 = vector.broadcast %c0_i32_14 : i32 to vector<32x128xi32>
    %34 = arith.cmpi slt, %30, %33 : vector<32x128xi32>
    %c0_i32_15 = arith.constant 0 : i32
    %35 = arith.cmpi slt, %28, %c0_i32_15 : i32
    %36 = vector.broadcast %35 : i1 to vector<32x128xi1>
    %37 = vector.broadcast %36 : vector<32x128xi1> to vector<32x128xi1>
    %38 = arith.xori %34, %37 : vector<32x128xi1>
    %39 = arith.andi %38, %32 : vector<32x128xi1>
    %40 = vector.broadcast %28 : i32 to vector<32x128xi32>
    %41 = arith.addi %30, %40 : vector<32x128xi32>
    %42 = arith.select %39, %41, %30 : vector<32x128xi1>, vector<32x128xi32>
    %c15_i32 = arith.constant 15 : i32
    %43 = vector.broadcast %c15_i32 : i32 to vector<32x128xi32>
    %44 = arith.cmpi ne, %42, %43 : vector<32x128xi32>
    %cst_16 = arith.constant 0.000000e+00 : f32
    %45 = vector.broadcast %cst_16 : f32 to vector<32x128xf32>
    %46 = arith.select %44, %25, %45 : vector<32x128xi1>, vector<32x128xf32>
    %47 = tpu.concatenate %24, %0, %46 in 1 : vector<32x128xf32>, vector<32x128xf32>, vector<32x128xf32> -> vector<32x384xf32>
    %c0_17 = arith.constant 0 : index
    %c0_18 = arith.constant 0 : index
    %48 = vector.load %arg1[%c0_17, %c0_18] : memref<384x256xf32, #tpu.memory_space<vmem>>, vector<384x256xf32>
    %cst_19 = arith.constant dense<0.000000e+00> : vector<32x256xf32>
    %49 = tpu.matmul %47, %48, %cst_19 {dimension_numbers = #tpu.dot_dimension_numbers<[1], [0], [0], [1], [0, 0, 1, 1], [], []>} : vector<32x384xf32>, vector<384x256xf32>, vector<32x256xf32> -> vector<32x256xf32>
    %50 = vector.extract_strided_slice %49 {offsets = [0, 0], sizes = [32, 128], strides = [1, 1]} : vector<32x256xf32> to vector<32x128xf32>
    %51 = vector.extract_strided_slice %49 {offsets = [0, 128], sizes = [32, 128], strides = [1, 1]} : vector<32x256xf32> to vector<32x128xf32>
    %52 = vector.extract_strided_slice %2 {offsets = [6, 0], sizes = [1, 128], strides = [1, 1]} : vector<8x128xf32> to vector<1x128xf32>
    %53 = vector.broadcast %52 : vector<1x128xf32> to vector<32x128xf32>
    %54 = arith.addf %51, %53 : vector<32x128xf32>
    %55 = vector.extract_strided_slice %2 {offsets = [0, 0], sizes = [1, 128], strides = [1, 1]} : vector<8x128xf32> to vector<1x128xf32>
    %56 = vector.extract_strided_slice %2 {offsets = [1, 0], sizes = [1, 128], strides = [1, 1]} : vector<8x128xf32> to vector<1x128xf32>
    %cst_20 = arith.constant dense<0.000000e+00> : vector<128xf32>
    %57 = vector.multi_reduction <add>, %50, %cst_20 [0] : vector<32x128xf32> to vector<128xf32>
    %58 = vector.shape_cast %57 : vector<128xf32> to vector<1x128xf32>
    %cst_21 = arith.constant dense<0.000000e+00> : vector<1x128xf32>
    %59 = tpu.matmul %58, %1, %cst_21 {dimension_numbers = #tpu.dot_dimension_numbers<[1], [0], [0], [1], [0, 0, 1, 1], [], []>} : vector<1x128xf32>, vector<128x128xf32>, vector<1x128xf32> -> vector<1x128xf32>
    %60 = vector.broadcast %59 : vector<1x128xf32> to vector<32x128xf32>
    %61 = arith.subf %50, %60 : vector<32x128xf32>
    %62 = arith.mulf %61, %61 : vector<32x128xf32>
    %cst_22 = arith.constant dense<0.000000e+00> : vector<128xf32>
    %63 = vector.multi_reduction <add>, %62, %cst_22 [0] : vector<32x128xf32> to vector<128xf32>
    %64 = vector.shape_cast %63 : vector<128xf32> to vector<1x128xf32>
    %cst_23 = arith.constant dense<0.000000e+00> : vector<1x128xf32>
    %65 = tpu.matmul %64, %1, %cst_23 {dimension_numbers = #tpu.dot_dimension_numbers<[1], [0], [0], [1], [0, 0, 1, 1], [], []>} : vector<1x128xf32>, vector<128x128xf32>, vector<1x128xf32> -> vector<1x128xf32>
    %cst_24 = arith.constant 9.99999974E-6 : f32
    %66 = vector.broadcast %cst_24 : f32 to vector<1x128xf32>
    %67 = arith.addf %65, %66 : vector<1x128xf32>
    %68 = math.rsqrt %67 : vector<1x128xf32>
    %69 = arith.mulf %55, %68 : vector<1x128xf32>
    %70 = vector.broadcast %69 : vector<1x128xf32> to vector<32x128xf32>
    %71 = arith.mulf %61, %70 : vector<32x128xf32>
    %72 = vector.broadcast %56 : vector<1x128xf32> to vector<32x128xf32>
    %73 = arith.addf %71, %72 : vector<32x128xf32>
    %cst_25 = arith.constant 0.000000e+00 : f32
    %74 = vector.broadcast %cst_25 : f32 to vector<32x128xf32>
    %75 = arith.maximumf %73, %74 : vector<32x128xf32>
    %c1_i32_26 = arith.constant 1 : i32
    %76 = tpu.dynamic_rotate %75 by %c1_i32_26 dim 0 : vector<32x128xf32>, i32 -> vector<32x128xf32>
    %77 = tpu.iota {dimensions = array<i32: 0>} : vector<32x128xi32>
    %c16_i32_27 = arith.constant 16 : i32
    %c0_i32_28 = arith.constant 0 : i32
    %78 = arith.cmpi eq, %c16_i32_27, %c0_i32_28 : i32
    %c1_i32_29 = arith.constant 1 : i32
    %79 = arith.select %78, %c1_i32_29, %c16_i32_27 : i32
    %80 = vector.broadcast %79 : i32 to vector<32x128xi32>
    %81 = arith.remsi %77, %80 : vector<32x128xi32>
    %c0_i32_30 = arith.constant 0 : i32
    %82 = vector.broadcast %c0_i32_30 : i32 to vector<32x128xi32>
    %83 = arith.cmpi ne, %81, %82 : vector<32x128xi32>
    %c0_i32_31 = arith.constant 0 : i32
    %84 = vector.broadcast %c0_i32_31 : i32 to vector<32x128xi32>
    %85 = arith.cmpi slt, %81, %84 : vector<32x128xi32>
    %c0_i32_32 = arith.constant 0 : i32
    %86 = arith.cmpi slt, %79, %c0_i32_32 : i32
    %87 = vector.broadcast %86 : i1 to vector<32x128xi1>
    %88 = vector.broadcast %87 : vector<32x128xi1> to vector<32x128xi1>
    %89 = arith.xori %85, %88 : vector<32x128xi1>
    %90 = arith.andi %89, %83 : vector<32x128xi1>
    %91 = vector.broadcast %79 : i32 to vector<32x128xi32>
    %92 = arith.addi %81, %91 : vector<32x128xi32>
    %93 = arith.select %90, %92, %81 : vector<32x128xi1>, vector<32x128xi32>
    %c0_i32_33 = arith.constant 0 : i32
    %94 = vector.broadcast %c0_i32_33 : i32 to vector<32x128xi32>
    %95 = arith.cmpi ne, %93, %94 : vector<32x128xi32>
    %cst_34 = arith.constant 0.000000e+00 : f32
    %96 = vector.broadcast %cst_34 : f32 to vector<32x128xf32>
    %97 = arith.select %95, %76, %96 : vector<32x128xi1>, vector<32x128xf32>
    %c31_i32_35 = arith.constant 31 : i32
    %98 = tpu.dynamic_rotate %75 by %c31_i32_35 dim 0 : vector<32x128xf32>, i32 -> vector<32x128xf32>
    %99 = tpu.iota {dimensions = array<i32: 0>} : vector<32x128xi32>
    %c16_i32_36 = arith.constant 16 : i32
    %c0_i32_37 = arith.constant 0 : i32
    %100 = arith.cmpi eq, %c16_i32_36, %c0_i32_37 : i32
    %c1_i32_38 = arith.constant 1 : i32
    %101 = arith.select %100, %c1_i32_38, %c16_i32_36 : i32
    %102 = vector.broadcast %101 : i32 to vector<32x128xi32>
    %103 = arith.remsi %99, %102 : vector<32x128xi32>
    %c0_i32_39 = arith.constant 0 : i32
    %104 = vector.broadcast %c0_i32_39 : i32 to vector<32x128xi32>
    %105 = arith.cmpi ne, %103, %104 : vector<32x128xi32>
    %c0_i32_40 = arith.constant 0 : i32
    %106 = vector.broadcast %c0_i32_40 : i32 to vector<32x128xi32>
    %107 = arith.cmpi slt, %103, %106 : vector<32x128xi32>
    %c0_i32_41 = arith.constant 0 : i32
    %108 = arith.cmpi slt, %101, %c0_i32_41 : i32
    %109 = vector.broadcast %108 : i1 to vector<32x128xi1>
    %110 = vector.broadcast %109 : vector<32x128xi1> to vector<32x128xi1>
    %111 = arith.xori %107, %110 : vector<32x128xi1>
    %112 = arith.andi %111, %105 : vector<32x128xi1>
    %113 = vector.broadcast %101 : i32 to vector<32x128xi32>
    %114 = arith.addi %103, %113 : vector<32x128xi32>
    %115 = arith.select %112, %114, %103 : vector<32x128xi1>, vector<32x128xi32>
    %c15_i32_42 = arith.constant 15 : i32
    %116 = vector.broadcast %c15_i32_42 : i32 to vector<32x128xi32>
    %117 = arith.cmpi ne, %115, %116 : vector<32x128xi32>
    %cst_43 = arith.constant 0.000000e+00 : f32
    %118 = vector.broadcast %cst_43 : f32 to vector<32x128xf32>
    %119 = arith.select %117, %98, %118 : vector<32x128xi1>, vector<32x128xf32>
    %120 = tpu.concatenate %97, %75, %119 in 1 : vector<32x128xf32>, vector<32x128xf32>, vector<32x128xf32> -> vector<32x384xf32>
    %c0_44 = arith.constant 0 : index
    %c0_45 = arith.constant 0 : index
    %121 = vector.load %arg2[%c0_44, %c0_45] : memref<384x128xf32, #tpu.memory_space<vmem>>, vector<384x128xf32>
    %cst_46 = arith.constant dense<0.000000e+00> : vector<32x128xf32>
    %122 = tpu.matmul %120, %121, %cst_46 {dimension_numbers = #tpu.dot_dimension_numbers<[1], [0], [0], [1], [0, 0, 1, 1], [], []>} : vector<32x384xf32>, vector<384x128xf32>, vector<32x128xf32> -> vector<32x128xf32>
    %123 = vector.extract_strided_slice %2 {offsets = [2, 0], sizes = [1, 128], strides = [1, 1]} : vector<8x128xf32> to vector<1x128xf32>
    %124 = vector.extract_strided_slice %2 {offsets = [3, 0], sizes = [1, 128], strides = [1, 1]} : vector<8x128xf32> to vector<1x128xf32>
    %cst_47 = arith.constant dense<0.000000e+00> : vector<128xf32>
    %125 = vector.multi_reduction <add>, %122, %cst_47 [0] : vector<32x128xf32> to vector<128xf32>
    %126 = vector.shape_cast %125 : vector<128xf32> to vector<1x128xf32>
    %cst_48 = arith.constant dense<0.000000e+00> : vector<1x128xf32>
    %127 = tpu.matmul %126, %1, %cst_48 {dimension_numbers = #tpu.dot_dimension_numbers<[1], [0], [0], [1], [0, 0, 1, 1], [], []>} : vector<1x128xf32>, vector<128x128xf32>, vector<1x128xf32> -> vector<1x128xf32>
    %128 = vector.broadcast %127 : vector<1x128xf32> to vector<32x128xf32>
    %129 = arith.subf %122, %128 : vector<32x128xf32>
    %130 = arith.mulf %129, %129 : vector<32x128xf32>
    %cst_49 = arith.constant dense<0.000000e+00> : vector<128xf32>
    %131 = vector.multi_reduction <add>, %130, %cst_49 [0] : vector<32x128xf32> to vector<128xf32>
    %132 = vector.shape_cast %131 : vector<128xf32> to vector<1x128xf32>
    %cst_50 = arith.constant dense<0.000000e+00> : vector<1x128xf32>
    %133 = tpu.matmul %132, %1, %cst_50 {dimension_numbers = #tpu.dot_dimension_numbers<[1], [0], [0], [1], [0, 0, 1, 1], [], []>} : vector<1x128xf32>, vector<128x128xf32>, vector<1x128xf32> -> vector<1x128xf32>
    %cst_51 = arith.constant 9.99999974E-6 : f32
    %134 = vector.broadcast %cst_51 : f32 to vector<1x128xf32>
    %135 = arith.addf %133, %134 : vector<1x128xf32>
    %136 = math.rsqrt %135 : vector<1x128xf32>
    %137 = arith.mulf %123, %136 : vector<1x128xf32>
    %138 = vector.broadcast %137 : vector<1x128xf32> to vector<32x128xf32>
    %139 = arith.mulf %129, %138 : vector<32x128xf32>
    %140 = vector.broadcast %124 : vector<1x128xf32> to vector<32x128xf32>
    %141 = arith.addf %139, %140 : vector<32x128xf32>
    %142 = vector.extract_strided_slice %2 {offsets = [4, 0], sizes = [1, 128], strides = [1, 1]} : vector<8x128xf32> to vector<1x128xf32>
    %143 = vector.extract_strided_slice %2 {offsets = [5, 0], sizes = [1, 128], strides = [1, 1]} : vector<8x128xf32> to vector<1x128xf32>
    %cst_52 = arith.constant dense<0.000000e+00> : vector<128xf32>
    %144 = vector.multi_reduction <add>, %54, %cst_52 [0] : vector<32x128xf32> to vector<128xf32>
    %145 = vector.shape_cast %144 : vector<128xf32> to vector<1x128xf32>
    %cst_53 = arith.constant dense<0.000000e+00> : vector<1x128xf32>
    %146 = tpu.matmul %145, %1, %cst_53 {dimension_numbers = #tpu.dot_dimension_numbers<[1], [0], [0], [1], [0, 0, 1, 1], [], []>} : vector<1x128xf32>, vector<128x128xf32>, vector<1x128xf32> -> vector<1x128xf32>
    %147 = vector.broadcast %146 : vector<1x128xf32> to vector<32x128xf32>
    %148 = arith.subf %54, %147 : vector<32x128xf32>
    %149 = arith.mulf %148, %148 : vector<32x128xf32>
    %cst_54 = arith.constant dense<0.000000e+00> : vector<128xf32>
    %150 = vector.multi_reduction <add>, %149, %cst_54 [0] : vector<32x128xf32> to vector<128xf32>
    %151 = vector.shape_cast %150 : vector<128xf32> to vector<1x128xf32>
    %cst_55 = arith.constant dense<0.000000e+00> : vector<1x128xf32>
    %152 = tpu.matmul %151, %1, %cst_55 {dimension_numbers = #tpu.dot_dimension_numbers<[1], [0], [0], [1], [0, 0, 1, 1], [], []>} : vector<1x128xf32>, vector<128x128xf32>, vector<1x128xf32> -> vector<1x128xf32>
    %cst_56 = arith.constant 9.99999974E-6 : f32
    %153 = vector.broadcast %cst_56 : f32 to vector<1x128xf32>
    %154 = arith.addf %152, %153 : vector<1x128xf32>
    %155 = math.rsqrt %154 : vector<1x128xf32>
    %156 = arith.mulf %142, %155 : vector<1x128xf32>
    %157 = vector.broadcast %156 : vector<1x128xf32> to vector<32x128xf32>
    %158 = arith.mulf %148, %157 : vector<32x128xf32>
    %159 = vector.broadcast %143 : vector<1x128xf32> to vector<32x128xf32>
    %160 = arith.addf %158, %159 : vector<32x128xf32>
    %161 = arith.addf %141, %160 : vector<32x128xf32>
    %cst_57 = arith.constant 0.000000e+00 : f32
    %162 = vector.broadcast %cst_57 : f32 to vector<32x128xf32>
    %163 = arith.maximumf %161, %162 : vector<32x128xf32>
    %c0_58 = arith.constant 0 : index
    %c0_59 = arith.constant 0 : index
    %164 = vector.load %arg5[%c0_58, %c0_59] : memref<32x128xf32, #tpu.memory_space<vmem>>, vector<32x128xf32>
    tpu.vector_store %arg5[%c0_58, %c0_59], %163 {strides = array<i32>} : memref<32x128xf32, #tpu.memory_space<vmem>>, vector<32x128xf32>,
    return
  }
}

</mosaic_0001>

<bundles_post_ra>
// kernel: tile.30
= control target key start
LH: loop header
LB: loop body
LE: loop exit
PB: predicated region body
PF: predicated region fallthrough
CT: control target
= control target key end

     0   :  { %s28_s0 = inlined_call_operand.vmem [shape: f32[8], index: 0, kind: input, shape index: {}]   ;;  %s29_s1 = inlined_call_operand.vmem [shape: f32[16,8], index: 1, kind: output, shape index: {}]  }
   0x1   :  { %v4_v0 = vld [vmem:[%s28_s0] ss:$0 sm:$0xff] }
   0x2   :  { %5 = vst [vmem:[%s29_s1] sm:$0xff] %v4_v0  ;;  %8 = vst [vmem:[%s29_s1 + $0x8] sm:$0xff] %v4_v0 }

// kernel: tile.49
= control target key start
LH: loop header
LB: loop body
LE: loop exit
PB: predicated region body
PF: predicated region fallthrough
CT: control target
= control target key end

     0   :  { %s131_s10 = smov 120   ;;  %s132_s11 = smov 104   ;;  %vm3_vm0 = vcmask 64512   ;;  %vm9_vm1 = vcmask 1048512   ;;  %vm15_vm2 = vcmask 982912   ;;  %vm21_vm3 = vcmask 917312   ;;  %s207_s0 = inlined_call_operand.vmem [shape: f32[16,8], index: 0, kind: input, shape index: {}]   ;;  %s208_s1 = inlined_call_operand.vmem [shape: f32[1,128], index: 1, kind: output, shape index: {}]  }
   0x1   :  { %v101_v0 = vld [vmem:[%s207_s0 + $0xf] sm:$0x1]   ;;  %v103_v1 = vld [vmem:[%s207_s0 + $0xd] sm:$0x1]   ;;  %v102_v2 = vld [vmem:[%s207_s0 + $0xe] sm:$0x1]  }
   0x2   :  { %7 = vrot.lane.b32.xlu0 %v101_v0, %s131_s10  ;;  %19 = vrot.lane.b32.xlu1 %v103_v1, %s132_s11  ;;  %v104_v3 = vld [vmem:[%s207_s0 + $0xc] sm:$0x1]   ;;  %s133_s16 = smov 112   ;;  %s134_s17 = smov 96   ;;  %v105_v4 = vld [vmem:[%s207_s0 + $0xb] sm:$0x1]  }
   0x3   :  { %v106_v5 = vld [vmem:[%s207_s0 + $0xa] sm:$0x1]   ;;  %v2_v6 = vld [vmem:[%s207_s0] sm:$0x1]   ;;  %s135_s24 = smov 88   ;;  %s136_s25 = smov 80  }
   0x4   :  { %4 = vst.msk [vmem:[#allocation0] sm:$0x1] %vm3_vm0, %v2_v6   ;;  %v107_v7 = vld [vmem:[%s207_s0 + $0x9] sm:$0x1]   ;;  %v108_v8 = vld [vmem:[%s207_s0 + $0x8] sm:$0x1]  }
   0x5   :  { %s137_s30 = smov 72   ;;  %s138_s2 = smov 64   ;;  %v109_v9 = vld [vmem:[%s207_s0 + $0x7] sm:$0x1]   ;;  %v110_v10 = vld [vmem:[%s207_s0 + $0x6] sm:$0x1]  }
   0x6   :  { %13 = vrot.lane.b32.xlu0 %v102_v2, %s133_s16  ;;  %25 = vrot.lane.b32.xlu1 %v104_v3, %s134_s17  ;;  %s139_s7 = smov 56   ;;  %s140_s8 = smov 48   ;;  %v111_v11 = vld [vmem:[%s207_s0 + $0x5] sm:$0x1]   ;;  %v112_v12 = vld [vmem:[%s207_s0 + $0x4] sm:$0x1]  }
   0x7   :  { %s141_s13 = smov 40   ;;  %s142_s14 = smov 32   ;;  %v113_v13 = vld [vmem:[%s207_s0 + $0x3] sm:$0x1]   ;;  %v114_v14 = vld [vmem:[%s207_s0 + $0x2] sm:$0x1]  }
   0x8   :  { %s143_s19 = smov 24   ;;  %s144_s20 = smov 16   ;;  %v115_v15 = vld [vmem:[%s207_s0 + $0x1] sm:$0x1]   ;;  %vm27_vm4 = vcmask 851712   ;;  %vm33_vm5 = vcmask 786112  }
   0x9   :  { %s145_s0 = smov 8   ;;  %vm39_vm6 = vcmask 720512   ;;  %vm45_vm7 = vcmask 654912   ;;  %vm51_vm8 = vcmask 589312   ;;  %vm57_vm9 = vcmask 523712  }
   0xa   :  { %31 = vrot.lane.b32.xlu0 %v105_v4, %s135_s24  ;;  %37 = vrot.lane.b32.xlu1 %v106_v5, %s136_s25  ;;  %vm63_vm10 = vcmask 458112   ;;  %vm69_vm11 = vcmask 392512   ;;  %vm75_vm12 = vcmask 326912   ;;  %vm81_vm13 = vcmask 261312  }
   0xb   :  { %vm87_vm14 = vcmask 195712   ;;  %vm93_vm15 = vcmask 130112  }
   0xe   :  { %43 = vrot.lane.b32.xlu0 %v107_v7, %s137_s30  ;;  %49 = vrot.lane.b32.xlu1 %v108_v8, %s138_s2 }
  0x12   :  { %55 = vrot.lane.b32.xlu0 %v109_v9, %s139_s7  ;;  %61 = vrot.lane.b32.xlu1 %v110_v10, %s140_s8 }
  0x16   :  { %67 = vrot.lane.b32.xlu0 %v111_v11, %s141_s13  ;;  %73 = vrot.lane.b32.xlu1 %v112_v12, %s142_s14 }
  0x1a   :  { %79 = vrot.lane.b32.xlu0 %v113_v13, %s143_s19  ;;  %85 = vrot.lane.b32.xlu1 %v114_v14, %s144_s20 }
  0x1e   :  { %91 = vrot.lane.b32.xlu0 %v115_v15, %s145_s0 }
  0x74   :  { %v8_v16 = vpop.permute.xlu0 %7   ;;  %v20_v17 = vpop.permute.xlu1 %19  }
  0x75   :  { %10 = vst.msk [vmem:[#allocation0] sm:$0x1] %vm9_vm1, %v8_v16  }
  0x78   :  { %v14_v18 = vpop.permute.xlu0 %13   ;;  %v26_v19 = vpop.permute.xlu1 %25  }
  0x79   :  { %16 = vst.msk [vmem:[#allocation0] sm:$0x1] %vm15_vm2, %v14_v18  }
  0x7a   :  { %22 = vst.msk [vmem:[#allocation0] sm:$0x1] %vm21_vm3, %v20_v17  }
  0x7b   :  { %28 = vst.msk [vmem:[#allocation0] sm:$0x1] %vm27_vm4, %v26_v19  }
  0x7c   :  { %v32_v20 = vpop.permute.xlu0 %31   ;;  %v38_v21 = vpop.permute.xlu1 %37  }
  0x7d   :  { %34 = vst.msk [vmem:[#allocation0] sm:$0x1] %vm33_vm5, %v32_v20  }
  0x7e   :  { %40 = vst.msk [vmem:[#allocation0] sm:$0x1] %vm39_vm6, %v38_v21  }
  0x80   :  { %v44_v22 = vpop.permute.xlu0 %43   ;;  %v50_v23 = vpop.permute.xlu1 %49  }
  0x81   :  { %46 = vst.msk [vmem:[#allocation0] sm:$0x1] %vm45_vm7, %v44_v22  }
  0x82   :  { %52 = vst.msk [vmem:[#allocation0] sm:$0x1] %vm51_vm8, %v50_v23  }
  0x84   :  { %v56_v24 = vpop.permute.xlu0 %55   ;;  %v62_v25 = vpop.permute.xlu1 %61  }
  0x85   :  { %58 = vst.msk [vmem:[#allocation0] sm:$0x1] %vm57_vm9, %v56_v24  }
  0x86   :  { %64 = vst.msk [vmem:[#allocation0] sm:$0x1] %vm63_vm10, %v62_v25  }
  0x88   :  { %v68_v26 = vpop.permute.xlu0 %67   ;;  %v74_v27 = vpop.permute.xlu1 %73  }
  0x89   :  { %70 = vst.msk [vmem:[#allocation0] sm:$0x1] %vm69_vm11, %v68_v26  }
  0x8a   :  { %76 = vst.msk [vmem:[#allocation0] sm:$0x1] %vm75_vm12, %v74_v27  }
  0x8c   :  { %v80_v28 = vpop.permute.xlu0 %79   ;;  %v86_v29 = vpop.permute.xlu1 %85  }
  0x8d   :  { %82 = vst.msk [vmem:[#allocation0] sm:$0x1] %vm81_vm13, %v80_v28  }
  0x8e   :  { %88 = vst.msk [vmem:[#allocation0] sm:$0x1] %vm87_vm14, %v86_v29  }
  0x90   :  { %v92_v30 = vpop.permute.xlu0 %91  }
  0x91   :  { %94 = vst.msk [vmem:[#allocation0] sm:$0x1] %vm93_vm15, %v92_v30  }
  0x98   :  { %v98_v31 = vld [vmem:[#allocation0] sm:$0x1] }
  0x99   :  { %100 = vst [vmem:[%s208_s1] sm:$0x1] %v98_v31 }

// kernel: residual_forward.1
= control target key start
LH: loop header
LB: loop body
LE: loop exit
PB: predicated region body
PF: predicated region fallthrough
CT: control target
= control target key end

     0   :  { %v1985_v3 = vmov 0.0|0.0   ;;  %vm1987_vm6 = vmmov 0   ;;  %s2823_s1 = inlined_call_operand.vmem [shape: f32[384,256], index: 1, kind: input, shape index: {}]   ;;  %s2824_s0 = inlined_call_operand.vmem [shape: f32[32,128], index: 0, kind: input, shape index: {}]   ;;  %s2825_s3 = inlined_call_operand.vmem [shape: f32[128,128], index: 3, kind: input, shape index: {}]   ;;  %s2826_s2 = inlined_call_operand.vmem [shape: f32[384,128], index: 2, kind: input, shape index: {}]   ;;  %s2827_s4 = inlined_call_operand.vmem [shape: f32[8,128], index: 4, kind: input, shape index: {}]   ;;  %s2828_s5 = inlined_call_operand.vmem [shape: f32[32,128], index: 5, kind: output, shape index: {}]  }
   0x1   :  { %v129_v0 = vld [vmem:[%s2823_s1 + $0x8] sm:$0xff]  ;;  %v131_v1 = vld [vmem:[%s2823_s1 + $0x18] sm:$0xff]  ;;  %v128_v2 = vld [vmem:[%s2823_s1] sm:$0xff]  ;;  %1760 = vmatprep.subr.bf16.mxu1 %v1985_v3 }
   0x2   :  { %v1664_v4 = vpack.c.bf16 %v131_v1, %v129_v0  ;;  %v130_v5 = vld [vmem:[%s2823_s1 + $0x10] sm:$0xff]  ;;  %v133_v6 = vld [vmem:[%s2823_s1 + $0x28] sm:$0xff]  ;;  %v135_v7 = vld [vmem:[%s2823_s1 + $0x38] sm:$0xff] }
   0x3   :  { %v1666_v8 = vpack.c.bf16 %v130_v5, %v128_v2  ;;  %v1668_v9 = vpack.c.bf16 %v135_v7, %v133_v6  ;;  %v132_v10 = vld [vmem:[%s2823_s1 + $0x20] sm:$0xff]  ;;  %v134_v11 = vld [vmem:[%s2823_s1 + $0x30] sm:$0xff]  ;;  %v137_v12 = vld [vmem:[%s2823_s1 + $0x48] sm:$0xff] }
   0x4   :  { %1665 = vmatprep.subr.bf16.mxu0 %v1664_v4  ;;  %v139_v13 = vld [vmem:[%s2823_s1 + $0x58] sm:$0xff]  ;;  %v1670_v14 = vpack.c.bf16 %v134_v11, %v132_v10  ;;  %v136_v16 = vld [vmem:[%s2823_s1 + $0x40] sm:$0xff]  ;;  %v138_v17 = vld [vmem:[%s2823_s1 + $0x50] sm:$0xff] }
   0x5   :  { %1667 = vmatpush1.bf16.msra.mxu0 %v1666_v8  ;;  %v1672_v15 = vpack.c.bf16 %v139_v13, %v137_v12  ;;  %v141_v18 = vld [vmem:[%s2823_s1 + $0x68] sm:$0xff]  ;;  %v143_v19 = vld [vmem:[%s2823_s1 + $0x78] sm:$0xff]  ;;  %v1674_v20 = vpack.c.bf16 %v138_v17, %v136_v16  ;;  %v140_v22 = vld [vmem:[%s2823_s1 + $0x60] sm:$0xff] }
   0x6   :  { %1669 = vmatprep.subr.bf16.mxu0 %v1668_v9  ;;  %v1676_v21 = vpack.c.bf16 %v143_v19, %v141_v18  ;;  %v142_v23 = vld [vmem:[%s2823_s1 + $0x70] sm:$0xff]  ;;  %v145_v24 = vld [vmem:[%s2823_s1 + $0x88] sm:$0xff]  ;;  %v147_v25 = vld [vmem:[%s2823_s1 + $0x98] sm:$0xff] }
   0x7   :  { %v1678_v26 = vpack.c.bf16 %v142_v23, %v140_v22  ;;  %v1680_v27 = vpack.c.bf16 %v147_v25, %v145_v24  ;;  %v144_v28 = vld [vmem:[%s2823_s1 + $0x80] sm:$0xff]  ;;  %v146_v29 = vld [vmem:[%s2823_s1 + $0x90] sm:$0xff]  ;;  %v149_v30 = vld [vmem:[%s2823_s1 + $0xa8] sm:$0xff] }
   0x8   :  { %v151_v31 = vld [vmem:[%s2823_s1 + $0xb8] sm:$0xff]  ;;  %v1682_v32 = vpack.c.bf16 %v146_v29, %v144_v28  ;;  %v148_v34 = vld [vmem:[%s2823_s1 + $0xa0] sm:$0xff]  ;;  %v150_v35 = vld [vmem:[%s2823_s1 + $0xb0] sm:$0xff]  ;;  %v45_v28 = vlaneseq }
   0x9   :  { %1671 = vmatpush1.bf16.msra.mxu0 %v1670_v14  ;;  %v1684_v33 = vpack.c.bf16 %v151_v31, %v149_v30  ;;  %v153_v36 = vld [vmem:[%s2823_s1 + $0xc8] sm:$0xff]  ;;  %v155_v37 = vld [vmem:[%s2823_s1 + $0xd8] sm:$0xff]  ;;  %v1686_v38 = vpack.c.bf16 %v150_v35, %v148_v34  ;;  %v152_v40 = vld [vmem:[%s2823_s1 + $0xc0] sm:$0xff] }
   0xa   :  { %1673 = vmatprep.subr.bf16.mxu0 %v1672_v15  ;;  %v1688_v39 = vpack.c.bf16 %v155_v37, %v153_v36  ;;  %v154_v41 = vld [vmem:[%s2823_s1 + $0xd0] sm:$0xff]  ;;  %v2106_v42 = vld [vmem:[%s2824_s0] sm:$0xff]  ;;  %v157_v43 = vld [vmem:[%s2823_s1 + $0xe8] sm:$0xff]  ;;  %v2221_v35 = vshrl.u32 %v45_v28, 7 }
   0xb   :  { %v159_v44 = vld [vmem:[%s2823_s1 + $0xf8] sm:$0xff]  ;;  %288 = vmatprep.mubr.f32.mxu0 %v2106_v42  ;;  %v1690_v45 = vpack.c.bf16 %v154_v41, %v152_v40  ;;  %v156_v47 = vld [vmem:[%s2823_s1 + $0xe0] sm:$0xff]  ;;  %v158_v48 = vld [vmem:[%s2823_s1 + $0xf0] sm:$0xff] }
   0xc   :  { %v1692_v46 = vpack.c.bf16 %v159_v44, %v157_v43  ;;  %v161_v49 = vld [vmem:[%s2823_s1 + $0x108] sm:$0xff]  ;;  %v163_v50 = vld [vmem:[%s2823_s1 + $0x118] sm:$0xff]  ;;  %v1694_v51 = vpack.c.bf16 %v158_v48, %v156_v47  ;;  %v160_v53 = vld [vmem:[%s2823_s1 + $0x100] sm:$0xff]  ;;  %v41_v44 = vrot.slane %v2106_v42, 7  ;;  %vm47_vm0 = vcmp.lt.s32.totalorder %v2221_v35, 1 }
   0xd   :  { %1675 = vmatpush1.bf16.msra.mxu0 %v1674_v20  ;;  %v1696_v52 = vpack.c.bf16 %v163_v50, %v161_v49  ;;  %v162_v54 = vld [vmem:[%s2823_s1 + $0x110] sm:$0xff]  ;;  %v165_v55 = vld [vmem:[%s2823_s1 + $0x128] sm:$0xff]  ;;  %v167_v56 = vld [vmem:[%s2823_s1 + $0x138] sm:$0xff]  ;;  %vm115_vm3 = vcmp.lt.s32.totalorder %v2221_v35, 7 }
   0xe   :  { %1677 = vmatprep.subr.bf16.mxu0 %v1676_v21  ;;  %v1698_v57 = vpack.c.bf16 %v162_v54, %v160_v53  ;;  %v164_v58 = vld [vmem:[%s2823_s1 + $0x120] sm:$0xff]  ;;  %v1700_v59 = vpack.c.bf16 %v167_v56, %v165_v55  ;;  %v166_v60 = vld [vmem:[%s2823_s1 + $0x130] sm:$0xff]  ;;  %v25_v62 = vld [vmem:[%s2825_s3 + $0x8] sm:$0xff]  ;;  %v53_v53 = vadd.s32 16, %v2221_v35 }
   0xf   :  { %v24_v61 = vld [vmem:[%s2825_s3] sm:$0xff]  ;;  %v169_v63 = vld [vmem:[%s2823_s1 + $0x148] sm:$0xff]  ;;  %v171_v0 = vld [vmem:[%s2823_s1 + $0x158] sm:$0xff]  ;;  %v1702_v2 = vpack.c.bf16 %v166_v60, %v164_v58 }
  0x10   :  { %v2157_v1 = vpack.c.bf16 %v25_v62, %v24_v61  ;;  %v1704_v4 = vpack.c.bf16 %v171_v0, %v169_v63  ;;  %v168_v5 = vld [vmem:[%s2823_s1 + $0x140] sm:$0xff]  ;;  %v170_v6 = vld [vmem:[%s2823_s1 + $0x150] sm:$0xff]  ;;  %v173_v7 = vld [vmem:[%s2823_s1 + $0x168] sm:$0xff] }
  0x11   :  { %1679 = vmatpush1.bf16.msra.mxu0 %v1678_v26  ;;  %v175_v8 = vld [vmem:[%s2823_s1 + $0x178] sm:$0xff]  ;;  %v1706_v9 = vpack.c.bf16 %v170_v6, %v168_v5  ;;  %v172_v11 = vld [vmem:[%s2823_s1 + $0x160] sm:$0xff]  ;;  %v174_v12 = vld [vmem:[%s2823_s1 + $0x170] sm:$0xff]  ;;  %v73_v5 = vand.u32 15, %v53_v53 }
  0x12   :  { %1681 = vmatprep.subr.bf16.mxu0 %v1680_v27  ;;  %1762 = vmatpush3.bf16.msra.mxu1 %v2157_v1  ;;  %v1708_v10 = vpack.c.bf16 %v175_v8, %v173_v7  ;;  %v177_v13 = vld [vmem:[%s2823_s1 + $0x188] sm:$0xff]  ;;  %v179_v14 = vld [vmem:[%s2823_s1 + $0x198] sm:$0xff]  ;;  %v1710_v15 = vpack.c.bf16 %v174_v12, %v172_v11  ;;  %v176_v17 = vld [vmem:[%s2823_s1 + $0x180] sm:$0xff] }
  0x13   :  { %1763 = vmatprep.subr.bf16.mxu1 %v1985_v3  ;;  %v1712_v16 = vpack.c.bf16 %v179_v14, %v177_v13  ;;  %v178_v18 = vld [vmem:[%s2823_s1 + $0x190] sm:$0xff]  ;;  %v181_v19 = vld [vmem:[%s2823_s1 + $0x1a8] sm:$0xff]  ;;  %v183_v20 = vld [vmem:[%s2823_s1 + $0x1b8] sm:$0xff]  ;;  %vm2307_vm2 = vcmp.ne.s32.totalorder %v73_v5, 0 }
  0x14   :  { %v1714_v21 = vpack.c.bf16 %v178_v18, %v176_v17  ;;  %v1716_v22 = vpack.c.bf16 %v183_v20, %v181_v19  ;;  %v180_v23 = vld [vmem:[%s2823_s1 + $0x1a0] sm:$0xff]  ;;  %v182_v24 = vld [vmem:[%s2823_s1 + $0x1b0] sm:$0xff]  ;;  %v185_v25 = vld [vmem:[%s2823_s1 + $0x1c8] sm:$0xff] }
  0x15   :  { %1683 = vmatpush1.bf16.msra.mxu0 %v1682_v32  ;;  %v187_v26 = vld [vmem:[%s2823_s1 + $0x1d8] sm:$0xff]  ;;  %v1718_v27 = vpack.c.bf16 %v182_v24, %v180_v23  ;;  %v184_v30 = vld [vmem:[%s2823_s1 + $0x1c0] sm:$0xff]  ;;  %v186_v31 = vld [vmem:[%s2823_s1 + $0x1d0] sm:$0xff] }
  0x16   :  { %1685 = vmatprep.subr.bf16.mxu0 %v1684_v33  ;;  %v1720_v29 = vpack.c.bf16 %v187_v26, %v185_v25  ;;  %v189_v32 = vld [vmem:[%s2823_s1 + $0x1e8] sm:$0xff]  ;;  %v191_v33 = vld [vmem:[%s2823_s1 + $0x1f8] sm:$0xff]  ;;  %v1722_v34 = vpack.c.bf16 %v186_v31, %v184_v30  ;;  %v188_v37 = vld [vmem:[%s2823_s1 + $0x1e0] sm:$0xff] }
  0x17   :  { %v1724_v36 = vpack.c.bf16 %v191_v33, %v189_v32  ;;  %v193_v40 = vld [vmem:[%s2823_s1 + $0x208] sm:$0xff]  ;;  %v195_v41 = vld [vmem:[%s2823_s1 + $0x218] sm:$0xff]  ;;  %v192_v48 = vld [vmem:[%s2823_s1 + $0x200] sm:$0xff] }
  0x18   :  { %v1728_v47 = vpack.c.bf16 %v195_v41, %v193_v40  ;;  %v194_v49 = vld [vmem:[%s2823_s1 + $0x210] sm:$0xff]  ;;  %v2253_v50 = vld [vmem:[%s2824_s0 + $0x8] sm:$0xff]  ;;  %v203_v63 = vld [vmem:[%s2823_s1 + $0x258] sm:$0xff] }
  0x19   :  { %1687 = vmatpush1.bf16.msra.mxu0 %v1686_v38  ;;  %v190_v38 = vld [vmem:[%s2823_s1 + $0x1f0] sm:$0xff]  ;;  %v1730_v56 = vpack.c.bf16 %v194_v49, %v192_v48  ;;  %v201_v62 = vld [vmem:[%s2823_s1 + $0x248] sm:$0xff]  ;;  %v200_v7 = vld [vmem:[%s2823_s1 + $0x240] sm:$0xff]  ;;  %v52_v49 = vadd.s32 8, %v2221_v35 }
  0x1a   :  { %1689 = vmatprep.subr.bf16.mxu0 %v1688_v39  ;;  %v2232_v39 = vld [vmem:[%s2824_s0 + $0x18] sm:$0xff]  ;;  %v1726_v43 = vpack.c.bf16 %v190_v38, %v188_v37  ;;  %v198_v60 = vld [vmem:[%s2823_s1 + $0x230] sm:$0xff]  ;;  %v1736_v6 = vpack.c.bf16 %v203_v63, %v201_v62  ;;  %v209_v17 = vld [vmem:[%s2823_s1 + $0x288] sm:$0xff] }
  0x1b   :  { %v2278_v61 = vld [vmem:[%s2824_s0 + $0x10] sm:$0xff]  ;;  %v211_v18 = vld [vmem:[%s2823_s1 + $0x298] sm:$0xff]  ;;  %v213_v24 = vld [vmem:[%s2823_s1 + $0x2a8] sm:$0xff]  ;;  %v66_v53 = vand.u32 15, %v52_v49 }
  0x1c   :  { %v202_v8 = vld [vmem:[%s2823_s1 + $0x250] sm:$0xff]  ;;  %v215_v25 = vld [vmem:[%s2823_s1 + $0x2b8] sm:$0xff]  ;;  %v217_v31 = vld [vmem:[%s2823_s1 + $0x2c8] sm:$0xff] }
  0x1d   :  { %1691 = vmatpush1.bf16.msra.mxu0 %v1690_v45  ;;  %v44_v45 = vrot.slane %v2232_v39, 7  ;;  %v1738_v11 = vpack.c.bf16 %v202_v8, %v200_v7  ;;  %v210_v23 = vld [vmem:[%s2823_s1 + $0x290] sm:$0xff]  ;;  %v1748_v28 = vpack.c.bf16 %v215_v25, %v213_v24  ;;  %v219_v32 = vld [vmem:[%s2823_s1 + $0x2d8] sm:$0xff]  ;;  %v221_v38 = vld [vmem:[%s2823_s1 + $0x2e8] sm:$0xff]  ;;  %vm2381_vm4 = vcmp.ne.s32.totalorder %v66_v53, 15 }
  0x1e   :  { %1693 = vmatprep.subr.bf16.mxu0 %v1692_v46  ;;  %v59_v46 = vand.u32 15, %v2221_v35  ;;  %v214_v30 = vld [vmem:[%s2823_s1 + $0x2b0] sm:$0xff]  ;;  %v223_v40 = vld [vmem:[%s2823_s1 + $0x2f8] sm:$0xff]  ;;  %v28_v63 = vld [vmem:[%s2825_s3 + $0x20] sm:$0xff] }
  0x1f   :  { %v51_v54 = vsel %vm47_vm0, %v44_v45, %v41_v44  ;;  %v218_v37 = vld [vmem:[%s2823_s1 + $0x2d0] sm:$0xff]  ;;  %v31_v5 = vld [vmem:[%s2825_s3 + $0x38] sm:$0xff]  ;;  %v32_v7 = vld [vmem:[%s2825_s3 + $0x40] sm:$0xff] }
  0x20   :  { %vm2264_vm1 = vcmp.ne.s32.totalorder %v59_v46, 0  ;;  %v111_v46 = vrot.slane %v2106_v42, 1  ;;  %v33_v8 = vld [vmem:[%s2825_s3 + $0x48] sm:$0xff] }
  0x21   :  { %1695 = vmatpush1.bf16.msra.mxu0 %v1694_v51  ;;  %v197_v51 = vld [vmem:[%s2823_s1 + $0x228] sm:$0xff] }
  0x22   :  { %1697 = vmatprep.subr.bf16.mxu0 %v1696_v52  ;;  %v199_v52 = vld [vmem:[%s2823_s1 + $0x238] sm:$0xff] }
  0x23   :  { %v1732_v58 = vpack.c.bf16 %v199_v52, %v197_v51  ;;  %v113_v51 = vrot.slane %v2278_v61, 1 }
  0x25   :  { %1699 = vmatpush1.bf16.msra.mxu0 %v1698_v57  ;;  %v42_v57 = vrot.slane %v2253_v50, 7 }
  0x26   :  { %1701 = vmatprep.subr.bf16.mxu0 %v1700_v59  ;;  %v196_v59 = vld [vmem:[%s2823_s1 + $0x220] sm:$0xff] }
  0x27   :  { %v1734_v0 = vpack.c.bf16 %v198_v60, %v196_v59 }
  0x29   :  { %1703 = vmatpush1.bf16.msra.mxu0 %v1702_v2  ;;  %v50_v2 = vsel %vm47_vm0, %v41_v44, %v42_v57  ;;  %v220_v44 = vld [vmem:[%s2823_s1 + $0x2e0] sm:$0xff] }
  0x2a   :  { %1705 = vmatprep.subr.bf16.mxu0 %v1704_v4  ;;  %v43_v4 = vrot.slane %v2278_v61, 7 }
  0x2c   :  { %v49_v12 = vsel %vm47_vm0, %v42_v57, %v43_v4  ;;  %v48_v20 = vsel %vm47_vm0, %v43_v4, %v44_v45  ;;  %v222_v45 = vld [vmem:[%s2823_s1 + $0x2f0] sm:$0xff] }
  0x2d   :  { %1707 = vmatpush1.bf16.msra.mxu0 %v1706_v9  ;;  %v205_v9 = vld [vmem:[%s2823_s1 + $0x268] sm:$0xff]  ;;  %v1758_v48 = vpack.c.bf16 %v222_v45, %v220_v44  ;;  %v30_v4 = vld [vmem:[%s2825_s3 + $0x30] sm:$0xff]  ;;  %v658_v44 = vld [vmem:[%s2826_s2 + $0x100] sm:$0xff] }
  0x2e   :  { %1709 = vmatprep.subr.bf16.mxu0 %v1708_v10  ;;  %v207_v10 = vld [vmem:[%s2823_s1 + $0x278] sm:$0xff]  ;;  %v659_v45 = vld [vmem:[%s2826_s2 + $0x108] sm:$0xff] }
  0x2f   :  { %v1740_v14 = vpack.c.bf16 %v207_v10, %v205_v9  ;;  %v2437_v9 = vpack.c.bf16 %v33_v8, %v32_v7  ;;  %v34_v10 = vld [vmem:[%s2825_s3 + $0x50] sm:$0xff]  ;;  %v626_v8 = vld [vmem:[%s2826_s2] sm:$0xff] }
  0x31   :  { %1711 = vmatpush1.bf16.msra.mxu0 %v1710_v15  ;;  %v204_v15 = vld [vmem:[%s2823_s1 + $0x260] sm:$0xff] }
  0x32   :  { %1713 = vmatprep.subr.bf16.mxu0 %v1712_v16  ;;  %v206_v16 = vld [vmem:[%s2823_s1 + $0x270] sm:$0xff] }
  0x33   :  { %v1742_v19 = vpack.c.bf16 %v206_v16, %v204_v15  ;;  %v37_v15 = vld [vmem:[%s2825_s3 + $0x68] sm:$0xff] }
  0x35   :  { %1715 = vmatpush1.bf16.msra.mxu0 %v1714_v21  ;;  %v1744_v21 = vpack.c.bf16 %v211_v18, %v209_v17  ;;  %v38_v17 = vld [vmem:[%s2825_s3 + $0x70] sm:$0xff]  ;;  %v39_v18 = vld [vmem:[%s2825_s3 + $0x78] sm:$0xff] }
  0x36   :  { %1717 = vmatprep.subr.bf16.mxu0 %v1716_v22  ;;  %v208_v22 = vld [vmem:[%s2823_s1 + $0x280] sm:$0xff] }
  0x37   :  { %v1746_v26 = vpack.c.bf16 %v210_v23, %v208_v22 }
  0x39   :  { %1719 = vmatpush1.bf16.msra.mxu0 %v1718_v27  ;;  %v1986_v27 = vmov 0.0  }
  0x3a   :  { %1721 = vmatprep.subr.bf16.mxu0 %v1720_v29  ;;  %v212_v29 = vld [vmem:[%s2823_s1 + $0x2a0] sm:$0xff]  ;;  %1448 = vmatprep.mubr.msk.f32.mxu1 %vm1987_vm6, %v1986_v27 }
  0x3b   :  { %v1750_v33 = vpack.c.bf16 %v214_v30, %v212_v29 }
  0x3d   :  { %1723 = vmatpush1.bf16.msra.mxu0 %v1722_v34  ;;  %v1752_v34 = vpack.c.bf16 %v219_v32, %v217_v31 }
  0x3e   :  { %1725 = vmatprep.subr.bf16.mxu0 %v1724_v36  ;;  %v216_v36 = vld [vmem:[%s2823_s1 + $0x2c0] sm:$0xff] }
  0x3f   :  { %v1754_v41 = vpack.c.bf16 %v218_v37, %v216_v36 }
  0x41   :  { %1727 = vmatpush1.bf16.msra.mxu0 %v1726_v43  ;;  %v1756_v43 = vpack.c.bf16 %v223_v40, %v221_v38  ;;  %v642_v40 = vld [vmem:[%s2826_s2 + $0x80] sm:$0xff] }
  0x42   :  { %1729 = vmatprep.subr.bf16.mxu0 %v1728_v47  ;;  %v112_v47 = vrot.slane %v2253_v50, 1 }
  0x44   :  { %1242 = vmatmul.mubr.msk.f32.vlgmr.msra.gmra.mrb[0].mxu0 %vm2264_vm1, %v51_v54  ;;  %v118_v52 = vsel %vm115_vm3, %v111_v46, %v112_v47  ;;  %v117_v42 = vsel %vm115_vm3, %v112_v47, %v113_v51  ;;  %v114_v54 = vrot.slane %v2232_v39, 1  ;;  %v2511_v47 = vsub.s32 0, %v2221_v35 }
  0x45   :  { %1731 = vmatpush1.bf16.msra.mxu0 %v1730_v56  ;;  %294 = vmatprep.mubr.f32.mxu0 %v2253_v50  ;;  %v54_v56 = vadd.s32 24, %v2221_v35 }
  0x46   :  { %1733 = vmatprep.subr.bf16.mxu0 %v1732_v58  ;;  %v116_v57 = vsel %vm115_vm3, %v113_v51, %v114_v54  ;;  %v119_v59 = vsel %vm115_vm3, %v114_v54, %v111_v46  ;;  %v1840_v46 = vpack.c.bf16 %v659_v45, %v658_v44  ;;  %v648_v44 = vld [vmem:[%s2826_s2 + $0xb0] sm:$0xff]  ;;  %v649_v45 = vld [vmem:[%s2826_s2 + $0xb8] sm:$0xff] }
  0x47   :  { %v80_v58 = vand.u32 15, %v54_v56 }
  0x48   :  { %295 = vmatmul.mubr.f32.gmra.mrb[2].mxu0 %v50_v2 }
  0x49   :  { %1735 = vmatpush1.bf16.msra.mxu0 %v1734_v0  ;;  %300 = vmatprep.mubr.f32.mxu0 %v2278_v61  ;;  %vm2395_vm5 = vcmp.ne.s32.totalorder %v80_v58, 15  ;;  %v27_v61 = vld [vmem:[%s2825_s3 + $0x18] sm:$0xff]  ;;  %v29_v0 = vld [vmem:[%s2825_s3 + $0x28] sm:$0xff] }
  0x4a   :  { %1737 = vmatprep.subr.bf16.mxu0 %v1736_v6  ;;  %v2417_v2 = vpack.c.bf16 %v29_v0, %v28_v63  ;;  %v2427_v6 = vpack.c.bf16 %v31_v5, %v30_v4 }
  0x4c   :  { %1243 = vmatmul.mubr.msk.f32.gmra.mrb[4].mxu0 %vm2307_vm2, %v49_v12 }
  0x4d   :  { %1739 = vmatpush1.bf16.msra.mxu0 %v1738_v11  ;;  %306 = vmatprep.mubr.f32.mxu0 %v2232_v39  ;;  %v26_v39 = vld [vmem:[%s2825_s3 + $0x10] sm:$0xff]  ;;  %v35_v11 = vld [vmem:[%s2825_s3 + $0x58] sm:$0xff] }
  0x4e   :  { %1741 = vmatprep.subr.bf16.mxu0 %v1740_v14  ;;  %v2407_v62 = vpack.c.bf16 %v27_v61, %v26_v39  ;;  %v2447_v12 = vpack.c.bf16 %v35_v11, %v34_v10  ;;  %v36_v14 = vld [vmem:[%s2825_s3 + $0x60] sm:$0xff]  ;;  %v627_v10 = vld [vmem:[%s2826_s2 + $0x8] sm:$0xff]  ;;  %v644_v11 = vld [vmem:[%s2826_s2 + $0x90] sm:$0xff] }
  0x4f   :  { %v2457_v16 = vpack.c.bf16 %v37_v15, %v36_v14  ;;  %v645_v14 = vld [vmem:[%s2826_s2 + $0x98] sm:$0xff] }
  0x50   :  { %307 = vmatmul.mubr.f32.gmra.mrb[6].mxu0 %v48_v20  ;;  %1765 = vmatpush3.bf16.msra.mxu1 %v2407_v62 }
  0x51   :  { %1743 = vmatpush1.bf16.msra.mxu0 %v1742_v19  ;;  %377 = vmatprep.mubr.f32.mxu0 %v1986_v27  ;;  %v2467_v19 = vpack.c.bf16 %v39_v18, %v38_v17  ;;  %v1810_v17 = vpack.c.bf16 %v627_v10, %v626_v8  ;;  %v652_v10 = vld [vmem:[%s2826_s2 + $0xd0] sm:$0xff] }
  0x52   :  { %1745 = vmatprep.subr.bf16.mxu0 %v1744_v21  ;;  %1766 = vmatprep.subr.bf16.mxu1 %v1985_v3 }
  0x54   :  { %1768 = vmatpush3.bf16.msra.mxu1 %v2417_v2 }
  0x55   :  { %1747 = vmatpush1.bf16.msra.mxu0 %v1746_v26  ;;  %1769 = vmatprep.subr.bf16.mxu1 %v1985_v3 }
  0x56   :  { %1749 = vmatprep.subr.bf16.mxu0 %v1748_v28 }
  0x58   :  { %1771 = vmatpush3.bf16.msra.mxu1 %v2427_v6 }
  0x59   :  { %1751 = vmatpush1.bf16.msra.mxu0 %v1750_v33  ;;  %1772 = vmatprep.subr.bf16.mxu1 %v1985_v3 }
  0x5a   :  { %1753 = vmatprep.subr.bf16.mxu0 %v1752_v34 }
  0x5c   :  { %1774 = vmatpush3.bf16.msra.mxu1 %v2437_v9 }
  0x5d   :  { %1755 = vmatpush1.bf16.msra.mxu0 %v1754_v41  ;;  %1775 = vmatprep.subr.bf16.mxu1 %v1985_v3  ;;  %v643_v41 = vld [vmem:[%s2826_s2 + $0x88] sm:$0xff] }
  0x5e   :  { %1757 = vmatprep.subr.bf16.mxu0 %v1756_v43  ;;  %v1808_v43 = vpack.c.bf16 %v643_v41, %v642_v40  ;;  %v663_v41 = vld [vmem:[%s2826_s2 + $0x128] sm:$0xff] }
  0x60   :  { %1777 = vmatpush3.bf16.msra.mxu1 %v2447_v12 }
  0x61   :  { %1759 = vmatpush1.bf16.msra.mxu0 %v1758_v48  ;;  %1778 = vmatprep.subr.bf16.mxu1 %v1985_v3 }
  0x62   :  { %1841 = vmatprep.subr.bf16.mxu0 %v1840_v46 }
  0x64   :  { %378 = vmatmul.mubr.f32.vlgmr.msra.gmra.mrb[0].mxu0 %v118_v52  ;;  %1780 = vmatpush3.bf16.msra.mxu1 %v2457_v16 }
  0x65   :  { %383 = vmatprep.mubr.f32.mxu0 %v1986_v27  ;;  %1781 = vmatprep.subr.bf16.mxu1 %v1985_v3 }
  0x66   :  { %1843 = vmatpush3.bf16.msra.mxu0 %v1840_v46  ;;  %v1820_v46 = vpack.c.bf16 %v649_v45, %v648_v44  ;;  %v641_v44 = vld [vmem:[%s2826_s2 + $0x78] sm:$0xff] }
  0x68   :  { %1244 = vmatmul.mubr.msk.f32.gmra.mrb[2].mxu0 %vm2381_vm4, %v117_v42  ;;  %1783 = vmatpush3.bf16.msra.mxu1 %v2467_v19 }
  0x69   :  { %389 = vmatprep.mubr.f32.mxu0 %v1986_v27  ;;  %1784 = vmatprep.subr.bf16.mxu1 %v1985_v3 }
  0x6c   :  { %390 = vmatmul.mubr.f32.gmra.mrb[4].mxu0 %v116_v57 }
  0x6d   :  { %395 = vmatprep.mubr.f32.mxu0 %v1986_v27 }
  0x70   :  { %1245 = vmatmul.mubr.msk.f32.gmra.mrb[6].mxu0 %vm2395_vm5, %v119_v59 }
 0x137   :  { %v379_v20 = vpop.f32.mrb[0].mxu0 }
 0x138   :  { %v2473_v21 = vpop.f32.mrb[1].mxu0 }
 0x13b   :  { %v385_v22 = vpop.f32.mrb[2].mxu0 }
 0x13c   :  { %v410_v23 = vadd.f32 %v385_v22, %v379_v20  ;;  %v2475_v24 = vpop.f32.mrb[3].mxu0 }
 0x13f   :  { %v391_v25 = vpop.f32.mrb[4].mxu0 }
 0x140   :  { %v411_v26 = vadd.f32 %v410_v23, %v391_v25  ;;  %v2477_v28 = vpop.f32.mrb[5].mxu0  ;;  %v629_v23 = vld [vmem:[%s2826_s2 + $0x18] sm:$0xff] }
 0x143   :  { %v397_v29 = vpop.f32.mrb[6].mxu0 }
 0x144   :  { %v412_v30 = vadd.f32 %v411_v26, %v397_v29  ;;  %v2479_v31 = vpop.f32.mrb[7].mxu0 }
 0x146   :  { %v413_v32 = vrot.slane %v412_v30, 4 }
 0x148   :  { %v414_v33 = vadd.f32 %v413_v32, %v412_v30  ;;  %v646_v32 = vld [vmem:[%s2826_s2 + $0xa0] sm:$0xff] }
 0x14a   :  { %v415_v34 = vrot.slane %v414_v33, 2 }
 0x14c   :  { %v416_v36 = vadd.f32 %v415_v34, %v414_v33  ;;  %v647_v33 = vld [vmem:[%s2826_s2 + $0xa8] sm:$0xff] }
 0x14d   :  { %v1816_v34 = vpack.c.bf16 %v647_v33, %v646_v32  ;;  %v639_v32 = vld [vmem:[%s2826_s2 + $0x68] sm:$0xff]  ;;  %v670_v33 = vld [vmem:[%s2826_s2 + $0x160] sm:$0xff] }
 0x14e   :  { %v417_v37 = vrot.slane %v416_v36, 1 }
 0x150   :  { %v418_v38 = vadd.f32 %v417_v37, %v416_v36  ;;  %v630_v36 = vld [vmem:[%s2826_s2 + $0x20] sm:$0xff]  ;;  %v631_v37 = vld [vmem:[%s2826_s2 + $0x28] sm:$0xff] }
 0x151   :  { %v1818_v40 = vpack.c.bf16 %v631_v37, %v630_v36 }
 0x152   :  { %1449 = vmatmul.mubr.f32.vlgmr.msra.gmra.mrb[0].mxu1 %v418_v38  ;;  %v662_v38 = vld [vmem:[%s2826_s2 + $0x120] sm:$0xff] }
 0x153   :  { %1786 = vmatpush3.bf16.msra.mxu1 %v2157_v1  ;;  %1483 = vmatprep.mubr.msk.f32.mxu1 %vm1987_vm6, %v1986_v27 }
 0x154   :  { %1787 = vmatprep.subr.bf16.mxu1 %v1985_v3 }
 0x157   :  { %1789 = vmatpush3.bf16.msra.mxu1 %v2407_v62 }
 0x158   :  { %1790 = vmatprep.subr.bf16.mxu1 %v1985_v3 }
 0x15b   :  { %1792 = vmatpush3.bf16.msra.mxu1 %v2417_v2 }
 0x15c   :  { %1793 = vmatprep.subr.bf16.mxu1 %v1985_v3 }
 0x15f   :  { %1795 = vmatpush3.bf16.msra.mxu1 %v2427_v6 }
 0x160   :  { %1796 = vmatprep.subr.bf16.mxu1 %v1985_v3 }
 0x163   :  { %1798 = vmatpush3.bf16.msra.mxu1 %v2437_v9 }
 0x164   :  { %1799 = vmatprep.subr.bf16.mxu1 %v1985_v3 }
 0x167   :  { %1801 = vmatpush3.bf16.msra.mxu1 %v2447_v12 }
 0x168   :  { %1802 = vmatprep.subr.bf16.mxu1 %v1985_v3 }
 0x16b   :  { %1804 = vmatpush3.bf16.msra.mxu1 %v2457_v16 }
 0x16c   :  { %1805 = vmatprep.subr.bf16.mxu1 %v1985_v3 }
 0x16f   :  { %1807 = vmatpush3.bf16.msra.mxu1 %v2467_v19 }
 0x170   :  { %1809 = vmatprep.subr.bf16.mxu1 %v1808_v43  ;;  %v1848_v43 = vpack.c.bf16 %v663_v41, %v662_v38  ;;  %v656_v38 = vld [vmem:[%s2826_s2 + $0xf0] sm:$0xff] }
 0x171   :  { %v640_v41 = vld [vmem:[%s2826_s2 + $0x70] sm:$0xff] }
 0x172   :  { %v1838_v45 = vpack.c.bf16 %v641_v44, %v640_v41 }
 0x225   :  { %v485_v48 = vpop.f32.mrb[0].mxu1 }
 0x226   :  { %v492_v49 = vrot.slane %v485_v48, %v2511_v47  ;;  %v1450_v51 = vpop.f32.mrb[1].mxu1  ;;  %v632_v48 = vld [vmem:[%s2826_s2 + $0x30] sm:$0xff] }
 0x227   :  { %v664_v51 = vld [vmem:[%s2826_s2 + $0x130] sm:$0xff] }
 0x228   :  { %v2514_v52 = vsub.f32 %v379_v20, %v492_v49  ;;  %v2516_v53 = vsub.f32 %v385_v22, %v492_v49  ;;  %v2518_v42 = vsub.f32 %v391_v25, %v492_v49  ;;  %v2520_v54 = vsub.f32 %v397_v29, %v492_v49  ;;  %v628_v22 = vld [vmem:[%s2826_s2 + $0x10] sm:$0xff]  ;;  %v661_v29 = vld [vmem:[%s2826_s2 + $0x118] sm:$0xff] }
 0x229   :  { %v1812_v20 = vpack.c.bf16 %v645_v14, %v644_v11  ;;  %v660_v25 = vld [vmem:[%s2826_s2 + $0x110] sm:$0xff]  ;;  %v1814_v26 = vpack.c.bf16 %v629_v23, %v628_v22  ;;  %v633_v49 = vld [vmem:[%s2826_s2 + $0x38] sm:$0xff] }
 0x22a   :  { %v497_v56 = vmul.f32 %v2514_v52, %v2514_v52  ;;  %v498_v57 = vmul.f32 %v2516_v53, %v2516_v53  ;;  %v499_v58 = vmul.f32 %v2518_v42, %v2518_v42  ;;  %v500_v39 = vmul.f32 %v2520_v54, %v2520_v54  ;;  %v653_v11 = vld [vmem:[%s2826_s2 + $0xd8] sm:$0xff] }
 0x22b   :  { %v1844_v30 = vpack.c.bf16 %v661_v29, %v660_v25  ;;  %v1828_v14 = vpack.c.bf16 %v653_v11, %v652_v10  ;;  %v669_v22 = vld [vmem:[%s2826_s2 + $0x158] sm:$0xff]  ;;  %v654_v25 = vld [vmem:[%s2826_s2 + $0xe0] sm:$0xff] }
 0x22c   :  { %v501_v59 = vadd.f32 %v498_v57, %v497_v56  ;;  %v1822_v56 = vpack.c.bf16 %v633_v49, %v632_v48  ;;  %v665_v57 = vld [vmem:[%s2826_s2 + $0x138] sm:$0xff]  ;;  %v638_v29 = vld [vmem:[%s2826_s2 + $0x60] sm:$0xff] }
 0x22d   :  { %1845 = vmatprep.subr.bf16.mxu0 %v1844_v30  ;;  %v1834_v36 = vpack.c.bf16 %v639_v32, %v638_v29  ;;  %v673_v48 = vld [vmem:[%s2826_s2 + $0x178] sm:$0xff] }
 0x22e   :  { %v502_v61 = vadd.f32 %v501_v59, %v499_v58  ;;  %1847 = vmatpush3.bf16.msra.mxu0 %v1844_v30  ;;  %v1852_v58 = vpack.c.bf16 %v665_v57, %v664_v51  ;;  %v650_v59 = vld [vmem:[%s2826_s2 + $0xc0] sm:$0xff] }
 0x22f   :  { %1849 = vmatprep.subr.bf16.mxu0 %v1848_v43 }
 0x230   :  { %v503_v63 = vadd.f32 %v502_v61, %v500_v39  ;;  %v651_v39 = vld [vmem:[%s2826_s2 + $0xc8] sm:$0xff] }
 0x231   :  { %v1824_v61 = vpack.c.bf16 %v651_v39, %v650_v59  ;;  %v2668_v39 = vld [vmem:[%s2827_s4] sm:$0xff] }
 0x232   :  { %v504_v0 = vrot.slane %v503_v63, 4  ;;  %1851 = vmatpush3.bf16.msra.mxu0 %v1848_v43 }
 0x233   :  { %1853 = vmatprep.subr.bf16.mxu0 %v1852_v58 }
 0x234   :  { %v505_v4 = vadd.f32 %v504_v0, %v503_v63  ;;  %v634_v63 = vld [vmem:[%s2826_s2 + $0x40] sm:$0xff]  ;;  %v635_v0 = vld [vmem:[%s2826_s2 + $0x48] sm:$0xff] }
 0x236   :  { %v506_v5 = vrot.slane %v505_v4, 2  ;;  %1855 = vmatpush3.bf16.msra.mxu0 %v1852_v58  ;;  %v592_v58 = vsub.s32 1, %v2221_v35 }
 0x238   :  { %v507_v7 = vadd.f32 %v506_v5, %v505_v4  ;;  %v666_v4 = vld [vmem:[%s2826_s2 + $0x140] sm:$0xff]  ;;  %v1826_v5 = vpack.c.bf16 %v635_v0, %v634_v63  ;;  %v593_v0 = vrot.slane %v2668_v39, %v592_v58 }
 0x23a   :  { %v508_v15 = vrot.slane %v507_v7, 1 }
 0x23c   :  { %v509_v18 = vadd.f32 %v508_v15, %v507_v7  ;;  %v667_v7 = vld [vmem:[%s2826_s2 + $0x148] sm:$0xff]  ;;  %v636_v15 = vld [vmem:[%s2826_s2 + $0x50] sm:$0xff] }
 0x23d   :  { %v1856_v8 = vpack.c.bf16 %v667_v7, %v666_v4 }
 0x23e   :  { %1484 = vmatmul.mubr.f32.vlgmr.msra.gmra.mrb[2].mxu1 %v509_v18  ;;  %v668_v18 = vld [vmem:[%s2826_s2 + $0x150] sm:$0xff] }
 0x23f   :  { %1811 = vmatpush3.bf16.msra.mxu1 %v1810_v17  ;;  %1857 = vmatprep.subr.bf16.mxu0 %v1856_v8  ;;  %v637_v17 = vld [vmem:[%s2826_s2 + $0x58] sm:$0xff]  ;;  %v1860_v23 = vpack.c.bf16 %v669_v22, %v668_v18 }
 0x240   :  { %1813 = vmatprep.subr.bf16.mxu1 %v1812_v20  ;;  %1859 = vmatpush3.bf16.msra.mxu0 %v1856_v8  ;;  %v1830_v20 = vpack.c.bf16 %v637_v17, %v636_v15 }
 0x241   :  { %1861 = vmatprep.subr.bf16.mxu0 %v1860_v23 }
 0x243   :  { %1815 = vmatpush3.bf16.msra.mxu1 %v1814_v26  ;;  %v655_v26 = vld [vmem:[%s2826_s2 + $0xe8] sm:$0xff] }
 0x244   :  { %1817 = vmatprep.subr.bf16.mxu1 %v1816_v34  ;;  %v1832_v30 = vpack.c.bf16 %v655_v26, %v654_v25  ;;  %v671_v34 = vld [vmem:[%s2826_s2 + $0x168] sm:$0xff]  ;;  %1863 = vmatpush3.bf16.msra.mxu0 %v1860_v23 }
 0x245   :  { %v1864_v37 = vpack.c.bf16 %v671_v34, %v670_v33 }
 0x247   :  { %1819 = vmatpush3.bf16.msra.mxu1 %v1818_v40  ;;  %v657_v40 = vld [vmem:[%s2826_s2 + $0xf8] sm:$0xff]  ;;  %1865 = vmatprep.subr.bf16.mxu0 %v1864_v37 }
 0x248   :  { %1821 = vmatprep.subr.bf16.mxu1 %v1820_v46  ;;  %v1836_v43 = vpack.c.bf16 %v657_v40, %v656_v38  ;;  %v672_v46 = vld [vmem:[%s2826_s2 + $0x170] sm:$0xff]  ;;  %1867 = vmatpush3.bf16.msra.mxu0 %v1864_v37 }
 0x249   :  { %v1868_v49 = vpack.c.bf16 %v673_v48, %v672_v46 }
 0x24b   :  { %1823 = vmatpush3.bf16.msra.mxu1 %v1822_v56  ;;  %1869 = vmatprep.subr.bf16.mxu0 %v1868_v49 }
 0x24c   :  { %1825 = vmatprep.subr.bf16.mxu1 %v1824_v61  ;;  %1871 = vmatpush3.bf16.msra.mxu0 %v1868_v49 }
 0x24d   :  { %1896 = vmatprep.subr.bf16.mxu0 %v1985_v3 }
 0x24f   :  { %1827 = vmatpush3.bf16.msra.mxu1 %v1826_v5 }
 0x250   :  { %1829 = vmatprep.subr.bf16.mxu1 %v1828_v14 }
 0x253   :  { %1831 = vmatpush3.bf16.msra.mxu1 %v1830_v20 }
 0x254   :  { %1833 = vmatprep.subr.bf16.mxu1 %v1832_v30 }
 0x257   :  { %1835 = vmatpush3.bf16.msra.mxu1 %v1834_v36 }
 0x258   :  { %1837 = vmatprep.subr.bf16.mxu1 %v1836_v43 }
 0x25b   :  { %1839 = vmatpush3.bf16.msra.mxu1 %v1838_v45 }
 0x25c   :  { %1872 = vmatprep.subr.bf16.mxu1 %v1985_v3 }
 0x311   :  { %v576_v51 = vpop.f32.mrb[2].mxu1 }
 0x312   :  { %v577_v56 = vadd.f32 1e-05, %v576_v51  ;;  %v1485_v57 = vpop.f32.mrb[3].mxu1 }
 0x314   :  { %1979 = vrsqrt.f32 %v577_v56 }
 0x31e   :  { %v1980_v59 = vpop.eup %1979 }
 0x31f   :  { %v581_v61 = vmul.f32 %v1980_v59, %v2668_v39 }
 0x321   :  { %v585_v63 = vrot.slane %v581_v61, %v2511_v47 }
 0x323   :  { %v586_v4 = vmul.f32 %v585_v63, %v2514_v52  ;;  %v589_v5 = vmul.f32 %v585_v63, %v2520_v54  ;;  %v587_v7 = vmul.f32 %v585_v63, %v2516_v53  ;;  %v588_v8 = vmul.f32 %v585_v63, %v2518_v42 }
 0x325   :  { %v594_v10 = vadd.f32 %v593_v0, %v586_v4  ;;  %v597_v11 = vadd.f32 %v593_v0, %v589_v5  ;;  %v595_v14 = vadd.f32 %v593_v0, %v587_v7  ;;  %v596_v15 = vadd.f32 %v593_v0, %v588_v8 }
 0x327   :  { %v598_v17 = vmax.f32 %v594_v10, 0.0  ;;  %v601_v18 = vmax.f32 %v597_v11, 0.0  ;;  %v599_v20 = vmax.f32 %v595_v14, 0.0  ;;  %v600_v22 = vmax.f32 %v596_v15, 0.0 }
 0x328   :  { %v404_v14 = vsub.s32 6, %v2221_v35 }
 0x329   :  { %v602_v23 = vrot.slane %v598_v17, 7  ;;  %738 = vmatprep.mubr.f32.mxu1 %v598_v17  ;;  %v605_v25 = vrot.slane %v601_v18, 7  ;;  %v614_v26 = vrot.slane %v598_v17, 1  ;;  %v615_v29 = vrot.slane %v599_v20, 1 }
 0x32a   :  { %v616_v52 = vrot.slane %v600_v22, 1  ;;  %v617_v30 = vrot.slane %v601_v18, 1  ;;  %v603_v54 = vrot.slane %v599_v20, 7  ;;  %v604_v36 = vrot.slane %v600_v22, 7 }
 0x32b   :  { %v609_v53 = vsel %vm47_vm0, %v605_v25, %v602_v23  ;;  %v620_v42 = vsel %vm115_vm3, %v614_v26, %v615_v29 }
 0x32c   :  { %1246 = vmatmul.mubr.msk.f32.vlgmr.msra.gmra.mrb[4].mxu1 %vm2264_vm1, %v609_v53  ;;  %1518 = vmatprep.mubr.f32.mxu0 %v620_v42  ;;  %v619_v32 = vsel %vm115_vm3, %v615_v29, %v616_v52  ;;  %v618_v33 = vsel %vm115_vm3, %v616_v52, %v617_v30  ;;  %v608_v34 = vsel %vm47_vm0, %v602_v23, %v603_v54 }
 0x32d   :  { %743 = vmatprep.mubr.f32.mxu1 %v599_v20  ;;  %1519 = vmatmul.mubr.msk.f32.vlgmr.msra.gmra.mrb[8].mxu0 %vm2381_vm4, %v619_v32  ;;  %v621_v55 = vsel %vm115_vm3, %v617_v30, %v614_v26  ;;  %v607_v50 = vsel %vm47_vm0, %v603_v54, %v604_v36  ;;  %v606_v60 = vsel %vm47_vm0, %v604_v36, %v605_v25 }
 0x32e   :  { %1521 = vmatprep.mubr.f32.mxu0 %v618_v33  ;;  %1874 = vmatpush3.bf16.msra.mxu1 %v2157_v1 }
 0x32f   :  { %1875 = vmatprep.subr.bf16.mxu1 %v1985_v3  ;;  %1898 = vmatpush3.bf16.msra.mxu0 %v2157_v1 }
 0x330   :  { %744 = vmatmul.mubr.f32.gmra.mrb[6].mxu1 %v608_v34  ;;  %1899 = vmatprep.subr.bf16.mxu0 %v1985_v3 }
 0x331   :  { %748 = vmatprep.mubr.f32.mxu1 %v600_v22  ;;  %1522 = vmatmul.mubr.msk.f32.gmra.mrb[10].mxu0 %vm2395_vm5, %v621_v55 }
 0x332   :  { %1877 = vmatpush3.bf16.msra.mxu1 %v2407_v62  ;;  %1591 = vmatprep.mubr.msk.f32.mxu0 %vm1987_vm6, %v1986_v27 }
 0x333   :  { %1878 = vmatprep.subr.bf16.mxu1 %v1985_v3  ;;  %1901 = vmatpush3.bf16.msra.mxu0 %v2407_v62 }
 0x334   :  { %1247 = vmatmul.mubr.msk.f32.gmra.mrb[8].mxu1 %vm2307_vm2, %v607_v50  ;;  %1902 = vmatprep.subr.bf16.mxu0 %v1985_v3 }
 0x335   :  { %753 = vmatprep.mubr.f32.mxu1 %v601_v18  ;;  %v405_v18 = vrot.slane %v2668_v39, %v404_v14 }
 0x336   :  { %1880 = vmatpush3.bf16.msra.mxu1 %v2417_v2 }
 0x337   :  { %1881 = vmatprep.subr.bf16.mxu1 %v1985_v3  ;;  %1904 = vmatpush3.bf16.msra.mxu0 %v2417_v2  ;;  %v2740_v22 = vadd.f32 %v405_v18, %v2475_v24  ;;  %v406_v25 = vadd.f32 %v405_v18, %v2473_v21  ;;  %v408_v26 = vadd.f32 %v405_v18, %v2477_v28 }
 0x338   :  { %754 = vmatmul.mubr.f32.gmra.mrb[10].mxu1 %v606_v60  ;;  %1905 = vmatprep.subr.bf16.mxu0 %v1985_v3  ;;  %v409_v52 = vadd.f32 %v405_v18, %v2479_v31 }
 0x339   :  { %1556 = vmatprep.mubr.msk.f32.mxu1 %vm1987_vm6, %v1986_v27  ;;  %v1035_v29 = vadd.f32 %v2740_v22, %v406_v25 }
 0x33a   :  { %1883 = vmatpush3.bf16.msra.mxu1 %v2427_v6 }
 0x33b   :  { %1884 = vmatprep.subr.bf16.mxu1 %v1985_v3  ;;  %1907 = vmatpush3.bf16.msra.mxu0 %v2427_v6  ;;  %v1036_v30 = vadd.f32 %v1035_v29, %v408_v26 }
 0x33c   :  { %1908 = vmatprep.subr.bf16.mxu0 %v1985_v3 }
 0x33d   :  { %v1037_v24 = vadd.f32 %v1036_v30, %v409_v52  ;;  %v1212_v30 = vsub.s32 4, %v2221_v35 }
 0x33e   :  { %1886 = vmatpush3.bf16.msra.mxu1 %v2437_v9 }
 0x33f   :  { %1887 = vmatprep.subr.bf16.mxu1 %v1985_v3  ;;  %1910 = vmatpush3.bf16.msra.mxu0 %v2437_v9  ;;  %v1038_v21 = vrot.slane %v1037_v24, 4 }
 0x340   :  { %1911 = vmatprep.subr.bf16.mxu0 %v1985_v3 }
 0x341   :  { %v1039_v28 = vadd.f32 %v1038_v21, %v1037_v24  ;;  %v1220_v24 = vsub.s32 5, %v2221_v35 }
 0x342   :  { %1889 = vmatpush3.bf16.msra.mxu1 %v2447_v12 }
 0x343   :  { %1890 = vmatprep.subr.bf16.mxu1 %v1985_v3  ;;  %1913 = vmatpush3.bf16.msra.mxu0 %v2447_v12  ;;  %v1040_v31 = vrot.slane %v1039_v28, 2 }
 0x344   :  { %1914 = vmatprep.subr.bf16.mxu0 %v1985_v3 }
 0x345   :  { %v1041_v53 = vadd.f32 %v1040_v31, %v1039_v28 }
 0x346   :  { %1892 = vmatpush3.bf16.msra.mxu1 %v2457_v16 }
 0x347   :  { %1893 = vmatprep.subr.bf16.mxu1 %v1985_v3  ;;  %1916 = vmatpush3.bf16.msra.mxu0 %v2457_v16  ;;  %v1042_v42 = vrot.slane %v1041_v53, 1 }
 0x348   :  { %1917 = vmatprep.subr.bf16.mxu0 %v1985_v3 }
 0x349   :  { %v1043_v54 = vadd.f32 %v1042_v42, %v1041_v53 }
 0x34a   :  { %1895 = vmatpush3.bf16.msra.mxu1 %v2467_v19 }
 0x34b   :  { %1920 = vmatprep.subr.bf16.mxu1 %v1985_v3  ;;  %1919 = vmatpush3.bf16.msra.mxu0 %v2467_v19 }
 0x34c   :  { %1944 = vmatprep.subr.bf16.mxu0 %v1985_v3 }
 0x3ff   :  { %v1316_v13 = vpop.f32.mrb[4].mxu1 }
 0x400   :  { %v1317_v37 = vpop.f32.mrb[5].mxu1  ;;  %v1520_v38 = vpop.f32.mrb[8].mxu0 }
 0x401   :  { %v1318_v40 = vadd.f32 %v1317_v37, %v1316_v13  ;;  %v825_v41 = vpop.f32.mrb[9].mxu0 }
 0x403   :  { %v826_v43 = vadd.f32 %v1318_v40, %v825_v41  ;;  %v1319_v44 = vpop.f32.mrb[6].mxu1 }
 0x404   :  { %v1320_v45 = vpop.f32.mrb[7].mxu1  ;;  %v1523_v46 = vpop.f32.mrb[10].mxu0 }
 0x405   :  { %v1321_v48 = vadd.f32 %v1320_v45, %v1319_v44  ;;  %v835_v49 = vpop.f32.mrb[11].mxu0 }
 0x407   :  { %v831_v51 = vadd.f32 %v1520_v38, %v1321_v48  ;;  %v1322_v56 = vpop.f32.mrb[8].mxu1 }
 0x408   :  { %v1323_v57 = vpop.f32.mrb[9].mxu1 }
 0x409   :  { %v1324_v58 = vadd.f32 %v1323_v57, %v1322_v56  ;;  %v844_v0 = vadd.f32 %v831_v51, %v826_v43 }
 0x40b   :  { %v836_v59 = vadd.f32 %v1324_v58, %v835_v49  ;;  %v1325_v61 = vpop.f32.mrb[10].mxu1 }
 0x40c   :  { %v1326_v63 = vpop.f32.mrb[11].mxu1 }
 0x40d   :  { %v1327_v4 = vadd.f32 %v1326_v63, %v1325_v61  ;;  %v845_v5 = vadd.f32 %v844_v0, %v836_v59 }
 0x40f   :  { %v841_v7 = vadd.f32 %v1523_v46, %v1327_v4 }
 0x411   :  { %v846_v8 = vadd.f32 %v845_v5, %v841_v7 }
 0x413   :  { %v847_v10 = vrot.slane %v846_v8, 4 }
 0x415   :  { %v848_v11 = vadd.f32 %v847_v10, %v846_v8 }
 0x417   :  { %v849_v15 = vrot.slane %v848_v11, 2 }
 0x419   :  { %v850_v17 = vadd.f32 %v849_v15, %v848_v11 }
 0x41b   :  { %v851_v20 = vrot.slane %v850_v17, 1 }
 0x41d   :  { %v852_v23 = vadd.f32 %v851_v20, %v850_v17 }
 0x41f   :  { %1557 = vmatmul.mubr.f32.vlgmr.msra.gmra.mrb[12].mxu1 %v852_v23 }
 0x420   :  { %1922 = vmatpush3.bf16.msra.mxu1 %v2157_v1  ;;  %1626 = vmatprep.mubr.msk.f32.mxu1 %vm1987_vm6, %v1986_v27 }
 0x421   :  { %1923 = vmatprep.subr.bf16.mxu1 %v1985_v3 }
 0x424   :  { %1925 = vmatpush3.bf16.msra.mxu1 %v2407_v62 }
 0x425   :  { %1926 = vmatprep.subr.bf16.mxu1 %v1985_v3 }
 0x428   :  { %1928 = vmatpush3.bf16.msra.mxu1 %v2417_v2 }
 0x429   :  { %1929 = vmatprep.subr.bf16.mxu1 %v1985_v3 }
 0x42c   :  { %1931 = vmatpush3.bf16.msra.mxu1 %v2427_v6 }
 0x42d   :  { %1932 = vmatprep.subr.bf16.mxu1 %v1985_v3 }
 0x430   :  { %1934 = vmatpush3.bf16.msra.mxu1 %v2437_v9 }
 0x431   :  { %1935 = vmatprep.subr.bf16.mxu1 %v1985_v3 }
 0x434   :  { %1937 = vmatpush3.bf16.msra.mxu1 %v2447_v12 }
 0x435   :  { %1938 = vmatprep.subr.bf16.mxu1 %v1985_v3 }
 0x438   :  { %1940 = vmatpush3.bf16.msra.mxu1 %v2457_v16 }
 0x439   :  { %1941 = vmatprep.subr.bf16.mxu1 %v1985_v3 }
 0x43c   :  { %1943 = vmatpush3.bf16.msra.mxu1 %v2467_v19 }
 0x43f   :  { %1627 = vmatmul.mubr.f32.vlgmr.msra.gmra.mrb[14].mxu1 %v1043_v54 }
 0x4f2   :  { %v919_v32 = vpop.f32.mrb[12].mxu1 }
 0x4f3   :  { %v926_v33 = vrot.slane %v919_v32, %v2511_v47  ;;  %v1558_v34 = vpop.f32.mrb[13].mxu1 }
 0x4f5   :  { %v2764_v36 = vsub.f32 %v826_v43, %v926_v33  ;;  %v2766_v55 = vsub.f32 %v831_v51, %v926_v33  ;;  %v2768_v50 = vsub.f32 %v836_v59, %v926_v33  ;;  %v2770_v60 = vsub.f32 %v841_v7, %v926_v33 }
 0x4f6   :  { %v1221_v33 = vrot.slane %v2668_v39, %v1220_v24 }
 0x4f7   :  { %v931_v13 = vmul.f32 %v2764_v36, %v2764_v36  ;;  %v932_v37 = vmul.f32 %v2766_v55, %v2766_v55  ;;  %v933_v38 = vmul.f32 %v2768_v50, %v2768_v50  ;;  %v934_v41 = vmul.f32 %v2770_v60, %v2770_v60 }
 0x4f9   :  { %v935_v40 = vadd.f32 %v932_v37, %v931_v13 }
 0x4fb   :  { %v936_v43 = vadd.f32 %v935_v40, %v933_v38 }
 0x4fd   :  { %v937_v44 = vadd.f32 %v936_v43, %v934_v41 }
 0x4ff   :  { %v938_v45 = vrot.slane %v937_v44, 4 }
 0x501   :  { %v939_v46 = vadd.f32 %v938_v45, %v937_v44 }
 0x503   :  { %v940_v48 = vrot.slane %v939_v46, 2 }
 0x505   :  { %v941_v49 = vadd.f32 %v940_v48, %v939_v46 }
 0x507   :  { %v942_v51 = vrot.slane %v941_v49, 1 }
 0x509   :  { %v943_v56 = vadd.f32 %v942_v51, %v941_v49 }
 0x50b   :  { %1592 = vmatmul.mubr.f32.vlgmr.msra.gmra.mrb[12].mxu0 %v943_v56 }
 0x50c   :  { %1946 = vmatpush3.bf16.msra.mxu0 %v2157_v1  ;;  %1661 = vmatprep.mubr.msk.f32.mxu0 %vm1987_vm6, %v1986_v27 }
 0x50d   :  { %1947 = vmatprep.subr.bf16.mxu0 %v1985_v3 }
 0x510   :  { %1949 = vmatpush3.bf16.msra.mxu0 %v2407_v62 }
 0x511   :  { %1950 = vmatprep.subr.bf16.mxu0 %v1985_v3 }
 0x512   :  { %v1110_v57 = vpop.f32.mrb[14].mxu1 }
 0x513   :  { %v1117_v58 = vrot.slane %v1110_v57, %v2511_v47  ;;  %v1628_v59 = vpop.f32.mrb[15].mxu1 }
 0x514   :  { %1952 = vmatpush3.bf16.msra.mxu0 %v2417_v2 }
 0x515   :  { %v1118_v61 = vsub.f32 %v406_v25, %v1117_v58  ;;  %v1119_v63 = vsub.f32 %v2740_v22, %v1117_v58  ;;  %v1120_v0 = vsub.f32 %v408_v26, %v1117_v58  ;;  %1953 = vmatprep.subr.bf16.mxu0 %v1985_v3  ;;  %v1121_v1 = vsub.f32 %v409_v52, %v1117_v58 }
 0x516   :  { %v1029_v26 = vsub.s32 3, %v2221_v35 }
 0x517   :  { %v1122_v27 = vmul.f32 %v1118_v61, %v1118_v61  ;;  %v1123_v4 = vmul.f32 %v1119_v63, %v1119_v63  ;;  %v1124_v62 = vmul.f32 %v1120_v0, %v1120_v0  ;;  %v1125_v7 = vmul.f32 %v1121_v1, %v1121_v1 }
 0x518   :  { %1955 = vmatpush3.bf16.msra.mxu0 %v2427_v6  ;;  %v1030_v21 = vrot.slane %v2668_v39, %v1029_v26 }
 0x519   :  { %v1126_v5 = vadd.f32 %v1123_v4, %v1122_v27  ;;  %1956 = vmatprep.subr.bf16.mxu0 %v1985_v3 }
 0x51b   :  { %v1127_v47 = vadd.f32 %v1126_v5, %v1124_v62 }
 0x51c   :  { %1958 = vmatpush3.bf16.msra.mxu0 %v2437_v9 }
 0x51d   :  { %v1128_v2 = vadd.f32 %v1127_v47, %v1125_v7  ;;  %1959 = vmatprep.subr.bf16.mxu0 %v1985_v3 }
 0x51f   :  { %v1129_v8 = vrot.slane %v1128_v2, 4 }
 0x520   :  { %1961 = vmatpush3.bf16.msra.mxu0 %v2447_v12 }
 0x521   :  { %1962 = vmatprep.subr.bf16.mxu0 %v1985_v3  ;;  %v1130_v10 = vadd.f32 %v1129_v8, %v1128_v2 }
 0x523   :  { %v1131_v11 = vrot.slane %v1130_v10, 2 }
 0x524   :  { %1964 = vmatpush3.bf16.msra.mxu0 %v2457_v16 }
 0x525   :  { %1965 = vmatprep.subr.bf16.mxu0 %v1985_v3  ;;  %v1132_v6 = vadd.f32 %v1131_v11, %v1130_v10  ;;  %v1021_v3 = vsub.s32 2, %v2221_v35 }
 0x527   :  { %v1133_v14 = vrot.slane %v1132_v6, 1 }
 0x528   :  { %1967 = vmatpush3.bf16.msra.mxu0 %v2467_v19 }
 0x529   :  { %v1134_v15 = vadd.f32 %v1133_v14, %v1132_v6 }
 0x52b   :  { %1662 = vmatmul.mubr.f32.vlgmr.msra.gmra.mrb[14].mxu0 %v1134_v15 }
 0x5de   :  { %v1010_v9 = vpop.f32.mrb[12].mxu0 }
 0x5df   :  { %v1593_v17 = vpop.f32.mrb[13].mxu0  ;;  %v1011_v18 = vadd.f32 1e-05, %v1010_v9 }
 0x5e1   :  { %1981 = vrsqrt.f32 %v1011_v18 }
 0x5eb   :  { %v1982_v23 = vpop.eup %1981 }
 0x5ec   :  { %v1016_v25 = vrot.slane %v1982_v23, 6 }
 0x5ee   :  { %v1018_v16 = vmul.f32 %v1016_v25, %v2668_v39 }
 0x5f0   :  { %v1022_v19 = vrot.slane %v1018_v16, %v1021_v3 }
 0x5f2   :  { %v1023_v31 = vmul.f32 %v1022_v19, %v2764_v36  ;;  %v1024_v53 = vmul.f32 %v1022_v19, %v2766_v55  ;;  %v1025_v42 = vmul.f32 %v1022_v19, %v2768_v50  ;;  %v1026_v54 = vmul.f32 %v1022_v19, %v2770_v60 }
 0x5f4   :  { %v1031_v35 = vadd.f32 %v1030_v21, %v1023_v31  ;;  %v1032_v40 = vadd.f32 %v1030_v21, %v1024_v53  ;;  %v1033_v41 = vadd.f32 %v1030_v21, %v1025_v42  ;;  %v1034_v43 = vadd.f32 %v1030_v21, %v1026_v54 }
 0x5fe   :  { %v1201_v20 = vpop.f32.mrb[14].mxu0 }
 0x5ff   :  { %v1202_v12 = vadd.f32 1e-05, %v1201_v20  ;;  %v1663_v22 = vpop.f32.mrb[15].mxu0 }
 0x601   :  { %1983 = vrsqrt.f32 %v1202_v12 }
 0x60b   :  { %v1984_v29 = vpop.eup %1983 }
 0x60c   :  { %v1207_v52 = vrot.slane %v1984_v29, 4 }
 0x60e   :  { %v1209_v28 = vmul.f32 %v1207_v52, %v2668_v39 }
 0x610   :  { %v1213_v32 = vrot.slane %v1209_v28, %v1212_v30 }
 0x612   :  { %v1214_v34 = vmul.f32 %v1213_v32, %v1118_v61  ;;  %v1215_v13 = vmul.f32 %v1213_v32, %v1119_v63  ;;  %v1216_v37 = vmul.f32 %v1213_v32, %v1120_v0  ;;  %v1217_v38 = vmul.f32 %v1213_v32, %v1121_v1 }
 0x614   :  { %v1222_v44 = vadd.f32 %v1221_v33, %v1214_v34  ;;  %v1223_v45 = vadd.f32 %v1221_v33, %v1215_v13  ;;  %v1224_v36 = vadd.f32 %v1221_v33, %v1216_v37  ;;  %v1225_v46 = vadd.f32 %v1221_v33, %v1217_v38 }
 0x616   :  { %v1226_v55 = vadd.f32 %v1222_v44, %v1031_v35  ;;  %v1227_v48 = vadd.f32 %v1223_v45, %v1032_v40  ;;  %v1228_v50 = vadd.f32 %v1224_v36, %v1033_v41  ;;  %v1229_v49 = vadd.f32 %v1225_v46, %v1034_v43 }
 0x618   :  { %v1230_v60 = vmax.f32 %v1226_v55, 0.0  ;;  %v1231_v51 = vmax.f32 %v1227_v48, 0.0  ;;  %v1232_v56 = vmax.f32 %v1228_v50, 0.0  ;;  %v1233_v39 = vmax.f32 %v1229_v49, 0.0 }
 0x61a   :  { %1234 = vst [vmem:[%s2828_s5] sm:$0xff] %v1230_v60  ;;  %1235 = vst [vmem:[%s2828_s5 + $0x8] sm:$0xff] %v1231_v51 }
 0x61b   :  { %1236 = vst [vmem:[%s2828_s5 + $0x10] sm:$0xff] %v1232_v56  ;;  %1237 = vst [vmem:[%s2828_s5 + $0x18] sm:$0xff] %v1233_v39 }

</bundles_post_ra>
